<compile_context>
chip_gen: v5e
topology: v5e:2x2
jax: 0.10.0
libtpu: 0.0.40
codegen_flags: <defaults>
</compile_context>

<pallas_src>
import functools

import numpy as np
import jax
import jax.numpy as jnp
from jax.experimental import pallas as pl
from jax.experimental.pallas import tpu as pltpu


# ----------------------------- Pallas kernel --------------------------------

def _make_fused_kernel(layer_cfg):
    """Builds the fused whole-network kernel.

    layer_cfg: static tuple of (use_bn, Ho, Wo, Cout) per layer.
    Ref order: [x_flat] + per-layer params (+BN params) + per-layer outputs.
    """

    def kernel(*refs):
        idx = 1
        per_layer = []
        for (use_bn, _, _, _) in layer_cfg:
            n = 6 if use_bn else 2
            per_layer.append(refs[idx:idx + n])
            idx += n
        out_refs = refs[idx:]

        h = refs[0][...]                                     # (N, Hin*Win*Cin)
        for li, (use_bn, _, _, _) in enumerate(layer_cfg):
            pr = per_layer[li]
            t_ref, b_ref = pr[0], pr[1]
            # conv-as-dense-matmul (f32 MXU accumulate) + bias
            y = jnp.dot(h, t_ref[...], preferred_element_type=jnp.float32)
            y = y + b_ref[...]
            if use_bn:
                r = pr[2][...]          # (P*C, C), entries 1/P  (pixel -> channel mean)
                em = pr[3][...]         # (C, P*C)               (channel -> pixel bcast)
                g = pr[4][...]          # (1, C)
                beta = pr[5][...]       # (1, C)
                # exact batch statistics over N * Ho * Wo per channel
                mean = jnp.mean(
                    jnp.dot(y, r, preferred_element_type=jnp.float32),
                    axis=0, keepdims=True)                   # (1, C)
                yc = y - jnp.dot(mean, em, preferred_element_type=jnp.float32)
                var = jnp.mean(
                    jnp.dot(yc * yc, r, preferred_element_type=jnp.float32),
                    axis=0, keepdims=True)                   # (1, C), biased
                scale = g * jax.lax.rsqrt(var + 1e-5)
                y = (yc * jnp.dot(scale, em, preferred_element_type=jnp.float32)
                     + jnp.dot(beta, em, preferred_element_type=jnp.float32))
            # LeakyReLU(0.2)
            y = jnp.where(y >= 0, y, 0.2 * y)
            out_refs[li][...] = y
            h = y

    return kernel


@functools.partial(jax.jit, static_argnums=(2,))
def _fused_forward(x_nchw, layer_arrays, layer_cfg):
    N, C, H, W = x_nchw.shape
    x_flat = jnp.transpose(x_nchw, (0, 2, 3, 1)).reshape(N, H * W * C)

    flat_inputs = [x_flat]
    for arrs in layer_arrays:
        flat_inputs.extend(arrs)

    out_shapes = tuple(jax.ShapeDtypeStruct((N, Ho * Wo * Cout), jnp.float32)
                       for (_, Ho, Wo, Cout) in layer_cfg)

    outs = pl.pallas_call(
        _make_fused_kernel(layer_cfg),
        out_shape=out_shapes,
        grid=(1,),
        in_specs=[pl.BlockSpec(a.shape, lambda i: (0, 0)) for a in flat_inputs],
        out_specs=tuple(pl.BlockSpec(s.shape, lambda i: (0, 0))
                        for s in out_shapes),
        compiler_params=pltpu.CompilerParams(
            dimension_semantics=("arbitrary",)),
    )(*flat_inputs)

    # back to the PyTorch NCHW outputs e[i]
    e = []
    for y, (_, Ho, Wo, Cout) in zip(outs, layer_cfg):
        e.append(jnp.transpose(y.reshape(N, Ho, Wo, Cout), (0, 3, 1, 2)))
    return e


# -------------------- one-time parameter packing (numpy) --------------------

def _conv_as_dense(w, Hin, Win, stride, pad):
    """Fold a (Cout, Cin, KH, KW) conv into a dense operator T acting on the
    flattened NHWC activation: T[(hi*Win+wi)*Cin+ci, (ho*Wo+wo)*Cout+co]."""
    Cout, Cin, KH, KW = w.shape
    Ho = (Hin + 2 * pad - KH) // stride + 1
    Wo = (Win + 2 * pad - KW) // stride + 1
    T = np.zeros((Hin * Win * Cin, Ho * Wo * Cout), np.float32)
    for ho in range(Ho):
        for kh in range(KH):
            hi = stride * ho + kh - pad
            if hi < 0 or hi >= Hin:
                continue
            for wo in range(Wo):
                for kw in range(KW):
                    wi = stride * wo + kw - pad
                    if wi < 0 or wi >= Win:
                        continue
                    r0 = (hi * Win + wi) * Cin
                    c0 = (ho * Wo + wo) * Cout
                    T[r0:r0 + Cin, c0:c0 + Cout] += w[:, :, kh, kw].T
    return T, Ho, Wo


def pack_params(params, input_hw):
    """Init-time preprocessing of the PyTorch-style params into the dense,
    VMEM-friendly operators consumed by the fused kernel."""
    Hin, Win = int(input_hw[0]), int(input_hw[1])
    layer_arrays = []
    layer_cfg = []
    for p in params:
        w = np.asarray(p["w"], np.float32)
        Cout = w.shape[0]
        T, Ho, Wo = _conv_as_dense(w, Hin, Win, p["stride"], p["pad"])
        b_row = np.tile(np.asarray(p["b"], np.float32), Ho * Wo)[None, :]
        arrs = [jnp.asarray(T), jnp.asarray(b_row)]
        if p["use_bn"]:
            P = Ho * Wo
            eye = np.eye(Cout, dtype=np.float32)
            r_mat = np.tile(eye, (P, 1)) / float(P)   # (P*C, C)
            e_mat = np.tile(eye, (1, P))              # (C, P*C)
            arrs += [jnp.asarray(r_mat), jnp.asarray(e_mat),
                     jnp.asarray(np.asarray(p["gamma"], np.float32)[None, :]),
                     jnp.asarray(np.asarray(p["beta"], np.float32)[None, :])]
        layer_arrays.append(tuple(arrs))
        layer_cfg.append((bool(p["use_bn"]), int(Ho), int(Wo), int(Cout)))
        Hin, Win = Ho, Wo
    return tuple(layer_arrays), tuple(layer_cfg)


def part_encoder_forward(x_nchw, params):
    """Returns the list self.e = [e0, ..., e_num_conv_layers] (NCHW each)."""
    layer_arrays, layer_cfg = pack_params(params, x_nchw.shape[2:])
    return _fused_forward(x_nchw, layer_arrays, layer_cfg)


# --------------------------- PartEncoder config ------------------------------

class Opts:
    c_dim = 4
    conv_dim = 8
    num_conv_layers = 2
    part_embed_dim = 16
    output_size = 16


def init_params(opts, key):
    conv_dims_in = [opts.c_dim]
    conv_dims_out = []
    for i in range(opts.num_conv_layers):
        powers = min(3, i)
        conv_dims_in.append(opts.conv_dim * 2 ** powers)
        conv_dims_out.append(opts.conv_dim * 2 ** powers)
    conv_dims_out.append(opts.part_embed_dim)

    params = []
    for i in range(opts.num_conv_layers + 1):
        if i == opts.num_conv_layers:
            k = int(opts.output_size // (2 ** opts.num_conv_layers))
            stride, pad = 1, 0
        else:
            k, stride, pad = 5, 2, 2
        cin, cout = conv_dims_in[i], conv_dims_out[i]
        key, wk, bk = jax.random.split(key, 3)
        fan_in = cin * k * k
        bound = float(1.0 / np.sqrt(fan_in))          # PyTorch-style uniform init
        w = jax.random.uniform(wk, (cout, cin, k, k), jnp.float32, -bound, bound)
        b = jax.random.uniform(bk, (cout,), jnp.float32, -bound, bound)
        use_bn = not (i == 0 or i == opts.num_conv_layers)
        gamma = jnp.ones((cout,), jnp.float32) if use_bn else None
        beta = jnp.zeros((cout,), jnp.float32) if use_bn else None
        params.append(dict(w=w, b=b, stride=stride, pad=pad,
                           use_bn=use_bn, gamma=gamma, beta=beta))
    return params


# ------------------------------ reference -----------------------------------

def reference_forward(x, params):
    e = []
    h = x
    for p in params:
        y = jax.lax.conv_general_dilated(
            h, p["w"], window_strides=(p["stride"], p["stride"]),
            padding=[(p["pad"], p["pad"]), (p["pad"], p["pad"])],
            dimension_numbers=("NCHW", "OIHW", "NCHW"))
        y = y + p["b"].reshape(1, -1, 1, 1)
        if p["use_bn"]:
            mean = jnp.mean(y, axis=(0, 2, 3), keepdims=True)
            var = jnp.mean((y - mean) ** 2, axis=(0, 2, 3), keepdims=True)
            y = (y - mean) * jax.lax.rsqrt(var + 1e-5)
            y = y * p["gamma"].reshape(1, -1, 1, 1) + p["beta"].reshape(1, -1, 1, 1)
        y = jnp.where(y >= 0, y, 0.2 * y)
        e.append(y)
        h = y
    return e


# --------------------------------- main --------------------------------------

if __name__ == "__main__":
    opts = Opts()
    key = jax.random.PRNGKey(0)
    key, pkey, xkey = jax.random.split(key, 3)
    params = init_params(opts, pkey)
    x = jax.random.normal(xkey, (2, opts.c_dim, opts.output_size, opts.output_size),
                          dtype=jnp.float32)

    # One-time parameter packing, then a single fused pallas_call per forward.
    layer_arrays, layer_cfg = pack_params(params, (opts.output_size, opts.output_size))
    outs = _fused_forward(x, layer_arrays, layer_cfg)
    outs = [jax.block_until_ready(o) for o in outs]

    refs = reference_forward(x, params)
    refs = [jax.block_until_ready(r) for r in refs]

    for o, r in zip(outs, refs):
        assert o.shape == r.shape, (o.shape, r.shape)
        np.testing.assert_allclose(np.asarray(o), np.asarray(r),
                                   rtol=1e-3, atol=1e-3)

    print("KERNEL_OK")
</pallas_src>

<mosaic_0001>
module attributes {stable_mosaic.version = 11 : i64} {
  func.func @kernel(%arg0: i32, %arg1: memref<2x1024xf32, #tpu.memory_space<vmem>>, %arg2: memref<1024x512xf32, #tpu.memory_space<vmem>>, %arg3: memref<1x512xf32, #tpu.memory_space<vmem>>, %arg4: memref<512x256xf32, #tpu.memory_space<vmem>>, %arg5: memref<1x256xf32, #tpu.memory_space<vmem>>, %arg6: memref<256x16xf32, #tpu.memory_space<vmem>>, %arg7: memref<16x256xf32, #tpu.memory_space<vmem>>, %arg8: memref<1x16xf32, #tpu.memory_space<vmem>>, %arg9: memref<1x16xf32, #tpu.memory_space<vmem>>, %arg10: memref<256x16xf32, #tpu.memory_space<vmem>>, %arg11: memref<1x16xf32, #tpu.memory_space<vmem>>, %arg12: memref<2x512xf32, #tpu.memory_space<vmem>>, %arg13: memref<2x256xf32, #tpu.memory_space<vmem>>, %arg14: memref<2x16xf32, #tpu.memory_space<vmem>>) attributes {dimension_semantics = [#tpu.dimension_semantics<arbitrary>], iteration_bounds = array<i64: 1>, scalar_prefetch = 0 : i64, scratch_operands = 0 : i64, tpu.core_type = #tpu.core_type<tc>, window_params = [{pipeline_mode = #tpu.pipeline_mode<synchronous>, transform_indices = @transform_0, window_bounds = array<i64: 2, 1024>}, {pipeline_mode = #tpu.pipeline_mode<synchronous>, transform_indices = @transform_1, window_bounds = array<i64: 1024, 512>}, {pipeline_mode = #tpu.pipeline_mode<synchronous>, transform_indices = @transform_2, window_bounds = array<i64: 1, 512>}, {pipeline_mode = #tpu.pipeline_mode<synchronous>, transform_indices = @transform_3, window_bounds = array<i64: 512, 256>}, {pipeline_mode = #tpu.pipeline_mode<synchronous>, transform_indices = @transform_4, window_bounds = array<i64: 1, 256>}, {pipeline_mode = #tpu.pipeline_mode<synchronous>, transform_indices = @transform_5, window_bounds = array<i64: 256, 16>}, {pipeline_mode = #tpu.pipeline_mode<synchronous>, transform_indices = @transform_6, window_bounds = array<i64: 16, 256>}, {pipeline_mode = #tpu.pipeline_mode<synchronous>, transform_indices = @transform_7, window_bounds = array<i64: 1, 16>}, {pipeline_mode = #tpu.pipeline_mode<synchronous>, transform_indices = @transform_8, window_bounds = array<i64: 1, 16>}, {pipeline_mode = #tpu.pipeline_mode<synchronous>, transform_indices = @transform_9, window_bounds = array<i64: 256, 16>}, {pipeline_mode = #tpu.pipeline_mode<synchronous>, transform_indices = @transform_10, window_bounds = array<i64: 1, 16>}, {pipeline_mode = #tpu.pipeline_mode<synchronous>, transform_indices = @transform_11, window_bounds = array<i64: 2, 512>}, {pipeline_mode = #tpu.pipeline_mode<synchronous>, transform_indices = @transform_12, window_bounds = array<i64: 2, 256>}, {pipeline_mode = #tpu.pipeline_mode<synchronous>, transform_indices = @transform_13, window_bounds = array<i64: 2, 16>}]} {
    %c0 = arith.constant 0 : index
    %c0_0 = arith.constant 0 : index
    %0 = vector.load %arg1[%c0, %c0_0] : memref<2x1024xf32, #tpu.memory_space<vmem>>, vector<2x1024xf32>
    %c0_1 = arith.constant 0 : index
    %c0_2 = arith.constant 0 : index
    %1 = vector.load %arg2[%c0_1, %c0_2] : memref<1024x512xf32, #tpu.memory_space<vmem>>, vector<1024x512xf32>
    %cst = arith.constant dense<0.000000e+00> : vector<2x512xf32>
    %2 = tpu.matmul %0, %1, %cst {dimension_numbers = #tpu.dot_dimension_numbers<[1], [0], [0], [1], [0, 0, 1, 1], [], []>} : vector<2x1024xf32>, vector<1024x512xf32>, vector<2x512xf32> -> vector<2x512xf32>
    %c0_3 = arith.constant 0 : index
    %c0_4 = arith.constant 0 : index
    %3 = vector.load %arg3[%c0_3, %c0_4] : memref<1x512xf32, #tpu.memory_space<vmem>>, vector<1x512xf32>
    %4 = vector.broadcast %3 : vector<1x512xf32> to vector<2x512xf32>
    %5 = arith.addf %2, %4 : vector<2x512xf32>
    %cst_5 = arith.constant 0.000000e+00 : f32
    %6 = vector.broadcast %cst_5 : f32 to vector<2x512xf32>
    %7 = arith.cmpf oge, %5, %6 : vector<2x512xf32>
    %cst_6 = arith.constant 2.000000e-01 : f32
    %8 = vector.broadcast %cst_6 : f32 to vector<2x512xf32>
    %9 = arith.mulf %8, %5 : vector<2x512xf32>
    %10 = arith.select %7, %5, %9 : vector<2x512xi1>, vector<2x512xf32>
    %c0_7 = arith.constant 0 : index
    %c0_8 = arith.constant 0 : index
    %11 = vector.load %arg12[%c0_7, %c0_8] : memref<2x512xf32, #tpu.memory_space<vmem>>, vector<2x512xf32>
    tpu.vector_store %arg12[%c0_7, %c0_8], %10 {strides = array<i32>} : memref<2x512xf32, #tpu.memory_space<vmem>>, vector<2x512xf32>,
    %c0_9 = arith.constant 0 : index
    %c0_10 = arith.constant 0 : index
    %12 = vector.load %arg4[%c0_9, %c0_10] : memref<512x256xf32, #tpu.memory_space<vmem>>, vector<512x256xf32>
    %cst_11 = arith.constant dense<0.000000e+00> : vector<2x256xf32>
    %13 = tpu.matmul %10, %12, %cst_11 {dimension_numbers = #tpu.dot_dimension_numbers<[1], [0], [0], [1], [0, 0, 1, 1], [], []>} : vector<2x512xf32>, vector<512x256xf32>, vector<2x256xf32> -> vector<2x256xf32>
    %c0_12 = arith.constant 0 : index
    %c0_13 = arith.constant 0 : index
    %14 = vector.load %arg5[%c0_12, %c0_13] : memref<1x256xf32, #tpu.memory_space<vmem>>, vector<1x256xf32>
    %15 = vector.broadcast %14 : vector<1x256xf32> to vector<2x256xf32>
    %16 = arith.addf %13, %15 : vector<2x256xf32>
    %c0_14 = arith.constant 0 : index
    %c0_15 = arith.constant 0 : index
    %17 = vector.load %arg6[%c0_14, %c0_15] : memref<256x16xf32, #tpu.memory_space<vmem>>, vector<256x16xf32>
    %c0_16 = arith.constant 0 : index
    %c0_17 = arith.constant 0 : index
    %18 = vector.load %arg7[%c0_16, %c0_17] : memref<16x256xf32, #tpu.memory_space<vmem>>, vector<16x256xf32>
    %c0_18 = arith.constant 0 : index
    %c0_19 = arith.constant 0 : index
    %19 = vector.load %arg8[%c0_18, %c0_19] : memref<1x16xf32, #tpu.memory_space<vmem>>, vector<1x16xf32>
    %c0_20 = arith.constant 0 : index
    %c0_21 = arith.constant 0 : index
    %20 = vector.load %arg9[%c0_20, %c0_21] : memref<1x16xf32, #tpu.memory_space<vmem>>, vector<1x16xf32>
    %cst_22 = arith.constant dense<0.000000e+00> : vector<2x16xf32>
    %21 = tpu.matmul %16, %17, %cst_22 {dimension_numbers = #tpu.dot_dimension_numbers<[1], [0], [0], [1], [0, 0, 1, 1], [], []>} : vector<2x256xf32>, vector<256x16xf32>, vector<2x16xf32> -> vector<2x16xf32>
    %cst_23 = arith.constant dense<0.000000e+00> : vector<16xf32>
    %22 = vector.multi_reduction <add>, %21, %cst_23 [0] : vector<2x16xf32> to vector<16xf32>
    %23 = vector.shape_cast %22 : vector<16xf32> to vector<1x16xf32>
    %cst_24 = arith.constant 2.000000e+00 : f32
    %24 = vector.broadcast %cst_24 : f32 to vector<1x16xf32>
    %25 = arith.divf %23, %24 : vector<1x16xf32>
    %cst_25 = arith.constant dense<0.000000e+00> : vector<1x256xf32>
    %26 = tpu.matmul %25, %18, %cst_25 {dimension_numbers = #tpu.dot_dimension_numbers<[1], [0], [0], [1], [0, 0, 1, 1], [], []>} : vector<1x16xf32>, vector<16x256xf32>, vector<1x256xf32> -> vector<1x256xf32>
    %27 = vector.broadcast %26 : vector<1x256xf32> to vector<2x256xf32>
    %28 = arith.subf %16, %27 : vector<2x256xf32>
    %29 = arith.mulf %28, %28 : vector<2x256xf32>
    %cst_26 = arith.constant dense<0.000000e+00> : vector<2x16xf32>
    %30 = tpu.matmul %29, %17, %cst_26 {dimension_numbers = #tpu.dot_dimension_numbers<[1], [0], [0], [1], [0, 0, 1, 1], [], []>} : vector<2x256xf32>, vector<256x16xf32>, vector<2x16xf32> -> vector<2x16xf32>
    %cst_27 = arith.constant dense<0.000000e+00> : vector<16xf32>
    %31 = vector.multi_reduction <add>, %30, %cst_27 [0] : vector<2x16xf32> to vector<16xf32>
    %32 = vector.shape_cast %31 : vector<16xf32> to vector<1x16xf32>
    %cst_28 = arith.constant 2.000000e+00 : f32
    %33 = vector.broadcast %cst_28 : f32 to vector<1x16xf32>
    %34 = arith.divf %32, %33 : vector<1x16xf32>
    %cst_29 = arith.constant 9.99999974E-6 : f32
    %35 = vector.broadcast %cst_29 : f32 to vector<1x16xf32>
    %36 = arith.addf %34, %35 : vector<1x16xf32>
    %37 = math.rsqrt %36 : vector<1x16xf32>
    %38 = arith.mulf %19, %37 : vector<1x16xf32>
    %cst_30 = arith.constant dense<0.000000e+00> : vector<1x256xf32>
    %39 = tpu.matmul %38, %18, %cst_30 {dimension_numbers = #tpu.dot_dimension_numbers<[1], [0], [0], [1], [0, 0, 1, 1], [], []>} : vector<1x16xf32>, vector<16x256xf32>, vector<1x256xf32> -> vector<1x256xf32>
    %40 = vector.broadcast %39 : vector<1x256xf32> to vector<2x256xf32>
    %41 = arith.mulf %28, %40 : vector<2x256xf32>
    %cst_31 = arith.constant dense<0.000000e+00> : vector<1x256xf32>
    %42 = tpu.matmul %20, %18, %cst_31 {dimension_numbers = #tpu.dot_dimension_numbers<[1], [0], [0], [1], [0, 0, 1, 1], [], []>} : vector<1x16xf32>, vector<16x256xf32>, vector<1x256xf32> -> vector<1x256xf32>
    %43 = vector.broadcast %42 : vector<1x256xf32> to vector<2x256xf32>
    %44 = arith.addf %41, %43 : vector<2x256xf32>
    %cst_32 = arith.constant 0.000000e+00 : f32
    %45 = vector.broadcast %cst_32 : f32 to vector<2x256xf32>
    %46 = arith.cmpf oge, %44, %45 : vector<2x256xf32>
    %cst_33 = arith.constant 2.000000e-01 : f32
    %47 = vector.broadcast %cst_33 : f32 to vector<2x256xf32>
    %48 = arith.mulf %47, %44 : vector<2x256xf32>
    %49 = arith.select %46, %44, %48 : vector<2x256xi1>, vector<2x256xf32>
    %c0_34 = arith.constant 0 : index
    %c0_35 = arith.constant 0 : index
    %50 = vector.load %arg13[%c0_34, %c0_35] : memref<2x256xf32, #tpu.memory_space<vmem>>, vector<2x256xf32>
    tpu.vector_store %arg13[%c0_34, %c0_35], %49 {strides = array<i32>} : memref<2x256xf32, #tpu.memory_space<vmem>>, vector<2x256xf32>,
    %c0_36 = arith.constant 0 : index
    %c0_37 = arith.constant 0 : index
    %51 = vector.load %arg10[%c0_36, %c0_37] : memref<256x16xf32, #tpu.memory_space<vmem>>, vector<256x16xf32>
    %cst_38 = arith.constant dense<0.000000e+00> : vector<2x16xf32>
    %52 = tpu.matmul %49, %51, %cst_38 {dimension_numbers = #tpu.dot_dimension_numbers<[1], [0], [0], [1], [0, 0, 1, 1], [], []>} : vector<2x256xf32>, vector<256x16xf32>, vector<2x16xf32> -> vector<2x16xf32>
    %c0_39 = arith.constant 0 : index
    %c0_40 = arith.constant 0 : index
    %53 = vector.load %arg11[%c0_39, %c0_40] : memref<1x16xf32, #tpu.memory_space<vmem>>, vector<1x16xf32>
    %54 = vector.broadcast %53 : vector<1x16xf32> to vector<2x16xf32>
    %55 = arith.addf %52, %54 : vector<2x16xf32>
    %cst_41 = arith.constant 0.000000e+00 : f32
    %56 = vector.broadcast %cst_41 : f32 to vector<2x16xf32>
    %57 = arith.cmpf oge, %55, %56 : vector<2x16xf32>
    %cst_42 = arith.constant 2.000000e-01 : f32
    %58 = vector.broadcast %cst_42 : f32 to vector<2x16xf32>
    %59 = arith.mulf %58, %55 : vector<2x16xf32>
    %60 = arith.select %57, %55, %59 : vector<2x16xi1>, vector<2x16xf32>
    %c0_43 = arith.constant 0 : index
    %c0_44 = arith.constant 0 : index
    %61 = vector.load %arg14[%c0_43, %c0_44] : memref<2x16xf32, #tpu.memory_space<vmem>>, vector<2x16xf32>
    tpu.vector_store %arg14[%c0_43, %c0_44], %60 {strides = array<i32>} : memref<2x16xf32, #tpu.memory_space<vmem>>, vector<2x16xf32>,
    return
  }
  func.func @transform_0(%arg0: i32) -> (i32, i32) {
    %c0_i32 = arith.constant 0 : i32
    %c0_i32_0 = arith.constant 0 : i32
    %c0_i32_1 = arith.constant 0 : i32
    return %c0_i32, %c0_i32_0 : i32, i32
  }
  func.func @transform_1(%arg0: i32) -> (i32, i32) {
    %c0_i32 = arith.constant 0 : i32
    %c0_i32_0 = arith.constant 0 : i32
    %c0_i32_1 = arith.constant 0 : i32
    return %c0_i32, %c0_i32_0 : i32, i32
  }
  func.func @transform_2(%arg0: i32) -> (i32, i32) {
    %c0_i32 = arith.constant 0 : i32
    %c0_i32_0 = arith.constant 0 : i32
    %c0_i32_1 = arith.constant 0 : i32
    return %c0_i32, %c0_i32_0 : i32, i32
  }
  func.func @transform_3(%arg0: i32) -> (i32, i32) {
    %c0_i32 = arith.constant 0 : i32
    %c0_i32_0 = arith.constant 0 : i32
    %c0_i32_1 = arith.constant 0 : i32
    return %c0_i32, %c0_i32_0 : i32, i32
  }
  func.func @transform_4(%arg0: i32) -> (i32, i32) {
    %c0_i32 = arith.constant 0 : i32
    %c0_i32_0 = arith.constant 0 : i32
    %c0_i32_1 = arith.constant 0 : i32
    return %c0_i32, %c0_i32_0 : i32, i32
  }
  func.func @transform_5(%arg0: i32) -> (i32, i32) {
    %c0_i32 = arith.constant 0 : i32
    %c0_i32_0 = arith.constant 0 : i32
    %c0_i32_1 = arith.constant 0 : i32
    return %c0_i32, %c0_i32_0 : i32, i32
  }
  func.func @transform_6(%arg0: i32) -> (i32, i32) {
    %c0_i32 = arith.constant 0 : i32
    %c0_i32_0 = arith.constant 0 : i32
    %c0_i32_1 = arith.constant 0 : i32
    return %c0_i32, %c0_i32_0 : i32, i32
  }
  func.func @transform_7(%arg0: i32) -> (i32, i32) {
    %c0_i32 = arith.constant 0 : i32
    %c0_i32_0 = arith.constant 0 : i32
    %c0_i32_1 = arith.constant 0 : i32
    return %c0_i32, %c0_i32_0 : i32, i32
  }
  func.func @transform_8(%arg0: i32) -> (i32, i32) {
    %c0_i32 = arith.constant 0 : i32
    %c0_i32_0 = arith.constant 0 : i32
    %c0_i32_1 = arith.constant 0 : i32
    return %c0_i32, %c0_i32_0 : i32, i32
  }
  func.func @transform_9(%arg0: i32) -> (i32, i32) {
    %c0_i32 = arith.constant 0 : i32
    %c0_i32_0 = arith.constant 0 : i32
    %c0_i32_1 = arith.constant 0 : i32
    return %c0_i32, %c0_i32_0 : i32, i32
  }
  func.func @transform_10(%arg0: i32) -> (i32, i32) {
    %c0_i32 = arith.constant 0 : i32
    %c0_i32_0 = arith.constant 0 : i32
    %c0_i32_1 = arith.constant 0 : i32
    return %c0_i32, %c0_i32_0 : i32, i32
  }
  func.func @transform_11(%arg0: i32) -> (i32, i32) {
    %c0_i32 = arith.constant 0 : i32
    %c0_i32_0 = arith.constant 0 : i32
    %c0_i32_1 = arith.constant 0 : i32
    return %c0_i32, %c0_i32_0 : i32, i32
  }
  func.func @transform_12(%arg0: i32) -> (i32, i32) {
    %c0_i32 = arith.constant 0 : i32
    %c0_i32_0 = arith.constant 0 : i32
    %c0_i32_1 = arith.constant 0 : i32
    return %c0_i32, %c0_i32_0 : i32, i32
  }
  func.func @transform_13(%arg0: i32) -> (i32, i32) {
    %c0_i32 = arith.constant 0 : i32
    %c0_i32_0 = arith.constant 0 : i32
    %c0_i32_1 = arith.constant 0 : i32
    return %c0_i32, %c0_i32_0 : i32, i32
  }
}

</mosaic_0001>

<bundles_post_ra>
// kernel: _fused_forward.1
= control target key start
LH: loop header
LB: loop body
LE: loop exit
PB: predicated region body
PF: predicated region fallthrough
CT: control target
= control target key end

     0   :  { %19 = vsyncpa [#allocation3], 0  ;;  %s2777_s0 = inlined_call_operand.vmem [shape: f32[2,1024], index: 0, kind: input, shape index: {}]   ;;  %s2778_s1 = inlined_call_operand.hbm [shape: f32[1024,512], index: 1, kind: input, shape index: {}]   ;;  %s2779_s2 = inlined_call_operand.hbm [shape: f32[1,512], index: 2, kind: input, shape index: {}]   ;;  %s2780_s3 = inlined_call_operand.hbm [shape: f32[512,256], index: 3, kind: input, shape index: {}]   ;;  %s2781_s4 = inlined_call_operand.hbm [shape: f32[1,256], index: 4, kind: input, shape index: {}]   ;;  %s2782_s5 = inlined_call_operand.vmem [shape: f32[256,16], index: 5, kind: input, shape index: {}]   ;;  %s2783_s6 = inlined_call_operand.hbm [shape: f32[16,256], index: 6, kind: input, shape index: {}]   ;;  %s2784_s7 = inlined_call_operand.hbm [shape: f32[1,16], index: 7, kind: input, shape index: {}]   ;;  %s2785_s8 = inlined_call_operand.hbm [shape: f32[1,16], index: 8, kind: input, shape index: {}]   ;;  %s2786_s9 = inlined_call_operand.vmem [shape: f32[256,16], index: 9, kind: input, shape index: {}]   ;;  %s2787_s10 = inlined_call_operand.hbm [shape: f32[1,16], index: 10, kind: input, shape index: {}]   ;;  %s2788_s11 = inlined_call_operand.vmem [shape: f32[2,512], index: 11, kind: output, shape index: {0}]   ;;  %s2789_s12 = inlined_call_operand.vmem [shape: f32[2,256], index: 12, kind: output, shape index: {1}]   ;;  %s2790_s13 = inlined_call_operand.hbm [shape: f32[2,16], index: 13, kind: output, shape index: {2}]  }
   0x1   :  { %20 = vsyncpa [#allocation6], 0 }
   0x2   :  { %21 = vsyncpa [#allocation9], 0 }
   0x3   :  { %22 = vsyncpa [#allocation12], 0 }
   0x4   :  { %23 = vsyncpa [#allocation15], 0  ;;  %s45_s27 = sshll.u32 %s2779_s2, 4  ;;  %s46_s27 = int_to_ptr.hbm [resolvable:$true] %s45_s27 }
   0x5   :  { %24 = vsyncpa [#allocation4], 0  ;;  %s2343_s28 = smov [#allocation5]   ;;  %s69_s15 = sshll.u32 %s2781_s4, 4  ;;  %s70_s15 = int_to_ptr.hbm [resolvable:$true] %s69_s15 }
   0x6   :  { %s47_s29 = sshll.u32 %s2343_s28, 4  ;;  %s2344_s16 = smov [#allocation8]   ;;  %s48_s29 = int_to_ptr.vmem [resolvable:$true] %s47_s29 }
   0x7   :  { %50 = dma.hbm_to_vmem [thread:$0]  %s46_s27, 64, %s48_s29, [#allocation6]  }
   0x8   :  { %s71_s17 = sshll.u32 %s2344_s16, 4  ;;  %s95_s20 = sshll.u32 %s2784_s7, 4  ;;  %s72_s17 = int_to_ptr.vmem [resolvable:$true] %s71_s17  ;;  %s96_s20 = int_to_ptr.hbm [resolvable:$true] %s95_s20 }
   0x9   :  { %74 = dma.hbm_to_vmem [thread:$0]  %s70_s15, 32, %s72_s17, [#allocation9]  }
   0xa   :  { %s31_s22 = sshll.u32 %s2778_s1, 4  ;;  %s2345_s23 = smov [#allocation11]   ;;  %s32_s22 = int_to_ptr.hbm [resolvable:$true] %s31_s22 }
   0xb   :  { %s97_s24 = sshll.u32 %s2345_s23, 4  ;;  %s2346_s4 = smov [#allocation2]   ;;  %s98_s24 = int_to_ptr.vmem [resolvable:$true] %s97_s24 }
   0xc   :  { %100 = dma.hbm_to_vmem [thread:$0]  %s96_s20, 16, %s98_s24, [#allocation12]  }
   0xd   :  { %s33_s25 = sshll.u32 %s2346_s4, 4  ;;  %s2347_s26 = smov 512   ;;  %s34_s25 = int_to_ptr.vmem [resolvable:$true] %s33_s25 }
   0xe   :  { %s2348_s27 = smov 32   ;;  %s55_s29 = sshll.u32 %s2780_s3, 4  ;;  %s56_s29 = int_to_ptr.hbm [resolvable:$true] %s55_s29 }
   0xf   :  { %39 = dma.hbm_to_vmem [thread:$0]  %s32_s22, 65536, %s34_s25, [#allocation3], %s2347_s26, %s2347_s26, %s2348_s27  }
  0x10   :  { %s2349_s30 = smov [#allocation7]   ;;  %s81_s16 = sshll.u32 %s2783_s6, 4  ;;  %s82_s16 = int_to_ptr.hbm [resolvable:$true] %s81_s16 }
  0x11   :  { %s57_s14 = sshll.u32 %s2349_s30, 4  ;;  %s2350_s17 = smov 256   ;;  %s58_s14 = int_to_ptr.vmem [resolvable:$true] %s57_s14 }
  0x12   :  { %s2351_s18 = smov 16   ;;  %s2352_s19 = smov [#allocation10]  }
  0x13   :  { %63 = dma.hbm_to_vmem [thread:$0]  %s56_s29, 16384, %s58_s14, [#allocation6], %s2350_s17, %s2350_s17, %s2351_s18  }
  0x14   :  { %s83_s20 = sshll.u32 %s2352_s19, 4  ;;  %s106_s22 = sshll.u32 %s2785_s8, 4  ;;  %s84_s20 = int_to_ptr.vmem [resolvable:$true] %s83_s20  ;;  %s107_s22 = int_to_ptr.hbm [resolvable:$true] %s106_s22 }
  0x15   :  { %89 = dma.hbm_to_vmem [thread:$0]  %s82_s16, 512, %s84_s20, [#allocation9], %s2350_s17, %s2350_s17, %s2351_s18  }
  0x16   :  { %s119_s24 = sshll.u32 %s2787_s10, 4  ;;  %s2353_s4 = smov [#allocation13]   ;;  %s120_s24 = int_to_ptr.hbm [resolvable:$true] %s119_s24 }
  0x17   :  { %s108_s25 = sshll.u32 %s2353_s4, 4  ;;  %s2354_s6 = smov [#allocation14]   ;;  %s109_s25 = int_to_ptr.vmem [resolvable:$true] %s108_s25 }
  0x18   :  { %111 = dma.hbm_to_vmem [thread:$0]  %s107_s22, 16, %s109_s25, [#allocation12]  }
  0x19   :  { %s121_s26 = sshll.u32 %s2354_s6, 4  ;;  %s122_s26 = int_to_ptr.vmem [resolvable:$true] %s121_s26 }
  0x1a   :  { %124 = dma.hbm_to_vmem [thread:$0]  %s120_s24, 16, %s122_s26, [#allocation15]  }
  0x1b   :  { %2331 = dma.done.wait [#allocation3], 65536  }
  0x1c   :  { %2332 = vsyncadd [#allocation3], 4294901760 }
  0x1d   :  { %2333 = dma.done.wait [#allocation6], 16448  }
  0x1e   :  { %2334 = vsyncadd [#allocation6], 4294950848 }
  0x1f   :  { %2335 = dma.done.wait [#allocation9], 544  }
  0x20   :  { %2336 = vsyncadd [#allocation9], 4294966752 }
  0x21   :  { %2337 = dma.done.wait [#allocation12], 32  }
  0x22   :  { %2338 = vsyncadd [#allocation12], 4294967264 }
  0x23   :  { %2339 = dma.done.wait [#allocation15], 16  }
  0x24   :  { %2340 = vsyncadd [#allocation15], 4294967280  ;;  %v219_v0 = vld [vmem:[#allocation2 + $0x1e0] sm:$0xff]  ;;  %vm1361_vm2 = vcmask 1041408   ;;  %vm1363_vm5 = vcmask 1045508   ;;  %vm1365_vm6 = vcmask 1043456  }
  0x25   :  { %v283_v1 = vld [vmem:[#allocation2 + $0x3e0] sm:$0xff]  ;;  %702 = vmatpush.msra.mxu0 %v219_v0  ;;  %vm1741_vm7 = vcmask 123904   ;;  %vm1757_vm9 = vcmask 130048   ;;  %s2356_s25 = smov [#allocation16]   ;;  %s2064_s10 = sshll.u32 %s2790_s13, 4  ;;  %s2065_s10 = int_to_ptr.hbm [resolvable:$true] %s2064_s10 }
  0x26   :  { %v347_v2 = vld [vmem:[#allocation2 + $0x5e0] sm:$0xff]  ;;  %722 = vmatpush.msra.mxu1 %v283_v1  ;;  %s2062_s6 = sshll.u32 %s2356_s25, 4  ;;  %s2063_s6 = int_to_ptr.vmem [resolvable:$true] %s2062_s6 }
  0x27   :  { %v215_v3 = vld [vmem:[#allocation2 + $0x1c0] sm:$0xff]  ;;  %742 = vmatpush.msra.mxu2 %v347_v2 }
  0x28   :  { %v279_v4 = vld [vmem:[#allocation2 + $0x3c0] sm:$0xff]  ;;  %703 = vmatpush.msra.mxu0 %v215_v3 }
  0x29   :  { %v343_v5 = vld [vmem:[#allocation2 + $0x5c0] sm:$0xff]  ;;  %723 = vmatpush.msra.mxu1 %v279_v4 }
  0x2a   :  { %v411_v6 = vld [vmem:[#allocation2 + $0x7e0] sm:$0xff]  ;;  %743 = vmatpush.msra.mxu2 %v343_v5 }
  0x2b   :  { %v211_v7 = vld [vmem:[#allocation2 + $0x1a0] sm:$0xff]  ;;  %762 = vmatpush.msra.mxu3 %v411_v6 }
  0x2c   :  { %v275_v8 = vld [vmem:[#allocation2 + $0x3a0] sm:$0xff]  ;;  %704 = vmatpush.msra.mxu0 %v211_v7 }
  0x2d   :  { %v339_v9 = vld [vmem:[#allocation2 + $0x5a0] sm:$0xff]  ;;  %724 = vmatpush.msra.mxu1 %v275_v8 }
  0x2e   :  { %v407_v10 = vld [vmem:[#allocation2 + $0x7c0] sm:$0xff]  ;;  %744 = vmatpush.msra.mxu2 %v339_v9 }
  0x2f   :  { %v207_v11 = vld [vmem:[#allocation2 + $0x180] sm:$0xff]  ;;  %763 = vmatpush.msra.mxu3 %v407_v10 }
  0x30   :  { %v271_v12 = vld [vmem:[#allocation2 + $0x380] sm:$0xff]  ;;  %705 = vmatpush.msra.mxu0 %v207_v11 }
  0x31   :  { %v335_v13 = vld [vmem:[#allocation2 + $0x580] sm:$0xff]  ;;  %725 = vmatpush.msra.mxu1 %v271_v12 }
  0x32   :  { %v403_v14 = vld [vmem:[#allocation2 + $0x7a0] sm:$0xff]  ;;  %745 = vmatpush.msra.mxu2 %v335_v13 }
  0x33   :  { %v203_v15 = vld [vmem:[#allocation2 + $0x160] sm:$0xff]  ;;  %764 = vmatpush.msra.mxu3 %v403_v14 }
  0x34   :  { %v267_v16 = vld [vmem:[#allocation2 + $0x360] sm:$0xff]  ;;  %706 = vmatpush.msra.mxu0 %v203_v15 }
  0x35   :  { %v331_v17 = vld [vmem:[#allocation2 + $0x560] sm:$0xff]  ;;  %726 = vmatpush.msra.mxu1 %v267_v16 }
  0x36   :  { %v399_v18 = vld [vmem:[#allocation2 + $0x780] sm:$0xff]  ;;  %746 = vmatpush.msra.mxu2 %v331_v17 }
  0x37   :  { %v199_v19 = vld [vmem:[#allocation2 + $0x140] sm:$0xff]  ;;  %765 = vmatpush.msra.mxu3 %v399_v18 }
  0x38   :  { %v263_v20 = vld [vmem:[#allocation2 + $0x340] sm:$0xff]  ;;  %707 = vmatpush.msra.mxu0 %v199_v19 }
  0x39   :  { %v327_v21 = vld [vmem:[#allocation2 + $0x540] sm:$0xff]  ;;  %727 = vmatpush.msra.mxu1 %v263_v20 }
  0x3a   :  { %v395_v22 = vld [vmem:[#allocation2 + $0x760] sm:$0xff]  ;;  %747 = vmatpush.msra.mxu2 %v327_v21 }
  0x3b   :  { %v195_v23 = vld [vmem:[#allocation2 + $0x120] sm:$0xff]  ;;  %766 = vmatpush.msra.mxu3 %v395_v22 }
  0x3c   :  { %v259_v24 = vld [vmem:[#allocation2 + $0x320] sm:$0xff]  ;;  %708 = vmatpush.msra.mxu0 %v195_v23  ;;  %v157_v23 = vld [vmem:[%s2777_s0] sm:$0xff] }
  0x3d   :  { %v323_v25 = vld [vmem:[#allocation2 + $0x520] sm:$0xff]  ;;  %728 = vmatpush.msra.mxu1 %v259_v24  ;;  %683 = vst [vmem:[#allocation1] ss:$4 sm:$0xff] %v157_v23 }
  0x3e   :  { %v391_v26 = vld [vmem:[#allocation2 + $0x740] sm:$0xff]  ;;  %748 = vmatpush.msra.mxu2 %v323_v25 }
  0x3f   :  { %v191_v27 = vld [vmem:[#allocation2 + $0x100] sm:$0xff]  ;;  %767 = vmatpush.msra.mxu3 %v391_v26 }
  0x40   :  { %v255_v28 = vld [vmem:[#allocation2 + $0x300] sm:$0xff]  ;;  %709 = vmatpush.msra.mxu0 %v191_v27 }
  0x41   :  { %v319_v29 = vld [vmem:[#allocation2 + $0x500] sm:$0xff]  ;;  %729 = vmatpush.msra.mxu1 %v255_v28 }
  0x42   :  { %v387_v30 = vld [vmem:[#allocation2 + $0x720] sm:$0xff]  ;;  %749 = vmatpush.msra.mxu2 %v319_v29 }
  0x43   :  { %v187_v31 = vld [vmem:[#allocation2 + $0xe0] sm:$0xff]  ;;  %768 = vmatpush.msra.mxu3 %v387_v30 }
  0x44   :  { %v251_v32 = vld [vmem:[#allocation2 + $0x2e0] sm:$0xff]  ;;  %710 = vmatpush.msra.mxu0 %v187_v31 }
  0x45   :  { %v315_v33 = vld [vmem:[#allocation2 + $0x4e0] sm:$0xff]  ;;  %730 = vmatpush.msra.mxu1 %v251_v32 }
  0x46   :  { %v383_v34 = vld [vmem:[#allocation2 + $0x700] sm:$0xff]  ;;  %750 = vmatpush.msra.mxu2 %v315_v33 }
  0x47   :  { %v183_v35 = vld [vmem:[#allocation2 + $0xc0] sm:$0xff]  ;;  %769 = vmatpush.msra.mxu3 %v383_v34 }
  0x48   :  { %v247_v36 = vld [vmem:[#allocation2 + $0x2c0] sm:$0xff]  ;;  %711 = vmatpush.msra.mxu0 %v183_v35 }
  0x49   :  { %v311_v37 = vld [vmem:[#allocation2 + $0x4c0] sm:$0xff]  ;;  %731 = vmatpush.msra.mxu1 %v247_v36 }
  0x4a   :  { %v379_v38 = vld [vmem:[#allocation2 + $0x6e0] sm:$0xff]  ;;  %751 = vmatpush.msra.mxu2 %v311_v37 }
  0x4b   :  { %v179_v39 = vld [vmem:[#allocation2 + $0xa0] sm:$0xff]  ;;  %770 = vmatpush.msra.mxu3 %v379_v38 }
  0x4c   :  { %v243_v40 = vld [vmem:[#allocation2 + $0x2a0] sm:$0xff]  ;;  %712 = vmatpush.msra.mxu0 %v179_v39 }
  0x4d   :  { %v307_v41 = vld [vmem:[#allocation2 + $0x4a0] sm:$0xff]  ;;  %732 = vmatpush.msra.mxu1 %v243_v40 }
  0x4e   :  { %v375_v42 = vld [vmem:[#allocation2 + $0x6c0] sm:$0xff]  ;;  %752 = vmatpush.msra.mxu2 %v307_v41 }
  0x4f   :  { %v175_v43 = vld [vmem:[#allocation2 + $0x80] sm:$0xff]  ;;  %771 = vmatpush.msra.mxu3 %v375_v42 }
  0x50   :  { %v239_v44 = vld [vmem:[#allocation2 + $0x280] sm:$0xff]  ;;  %713 = vmatpush.msra.mxu0 %v175_v43 }
  0x51   :  { %v303_v45 = vld [vmem:[#allocation2 + $0x480] sm:$0xff]  ;;  %733 = vmatpush.msra.mxu1 %v239_v44 }
  0x52   :  { %v371_v46 = vld [vmem:[#allocation2 + $0x6a0] sm:$0xff]  ;;  %753 = vmatpush.msra.mxu2 %v303_v45 }
  0x53   :  { %v171_v47 = vld [vmem:[#allocation2 + $0x60] sm:$0xff]  ;;  %772 = vmatpush.msra.mxu3 %v371_v46 }
  0x54   :  { %v235_v48 = vld [vmem:[#allocation2 + $0x260] sm:$0xff]  ;;  %714 = vmatpush.msra.mxu0 %v171_v47 }
  0x55   :  { %v299_v49 = vld [vmem:[#allocation2 + $0x460] sm:$0xff]  ;;  %734 = vmatpush.msra.mxu1 %v235_v48 }
  0x56   :  { %v367_v50 = vld [vmem:[#allocation2 + $0x680] sm:$0xff]  ;;  %754 = vmatpush.msra.mxu2 %v299_v49 }
  0x57   :  { %v167_v51 = vld [vmem:[#allocation2 + $0x40] sm:$0xff]  ;;  %773 = vmatpush.msra.mxu3 %v367_v50 }
  0x58   :  { %v231_v52 = vld [vmem:[#allocation2 + $0x240] sm:$0xff]  ;;  %715 = vmatpush.msra.mxu0 %v167_v51 }
  0x59   :  { %v295_v53 = vld [vmem:[#allocation2 + $0x440] sm:$0xff]  ;;  %735 = vmatpush.msra.mxu1 %v231_v52 }
  0x5a   :  { %v363_v54 = vld [vmem:[#allocation2 + $0x660] sm:$0xff]  ;;  %755 = vmatpush.msra.mxu2 %v295_v53 }
  0x5b   :  { %v163_v55 = vld [vmem:[#allocation2 + $0x20] sm:$0xff]  ;;  %774 = vmatpush.msra.mxu3 %v363_v54 }
  0x5c   :  { %v227_v56 = vld [vmem:[#allocation2 + $0x220] sm:$0xff]  ;;  %716 = vmatpush.msra.mxu0 %v163_v55 }
  0x5d   :  { %v291_v57 = vld [vmem:[#allocation2 + $0x420] sm:$0xff]  ;;  %736 = vmatpush.msra.mxu1 %v227_v56 }
  0x5e   :  { %v359_v58 = vld [vmem:[#allocation2 + $0x640] sm:$0xff]  ;;  %756 = vmatpush.msra.mxu2 %v291_v57 }
  0x5f   :  { %v159_v59 = vld [vmem:[#allocation2] sm:$0xff]  ;;  %775 = vmatpush.msra.mxu3 %v359_v58 }
  0x60   :  { %v223_v60 = vld [vmem:[#allocation2 + $0x200] sm:$0xff]  ;;  %717 = vmatpush.msra.mxu0 %v159_v59 }
  0x61   :  { %v287_v61 = vld [vmem:[#allocation2 + $0x400] sm:$0xff]  ;;  %737 = vmatpush.msra.mxu1 %v223_v60 }
  0x62   :  { %v355_v62 = vld [vmem:[#allocation2 + $0x620] sm:$0xff]  ;;  %757 = vmatpush.msra.mxu2 %v287_v61  ;;  %v2457_v61 = vld.sshfl [vmem:[#allocation1 + $0x10] sm:$0xff pattern:$0x73625140] }
  0x63   :  { %v475_v63 = vld [vmem:[#allocation2 + $0x9e0] sm:$0xff]  ;;  %776 = vmatpush.msra.mxu3 %v355_v62  ;;  %758 = vmatmul.f32.vlgmr.msra.gmra.mxu2 %v2457_v61 }
  0x64   :  { %v539_v0 = vld [vmem:[#allocation2 + $0xbe0] sm:$0xff]  ;;  %782 = vmatpush.msrb.mxu0 %v475_v63 }
  0x65   :  { %v603_v1 = vld [vmem:[#allocation2 + $0xde0] sm:$0xff]  ;;  %802 = vmatpush.msrb.mxu1 %v539_v0 }
  0x66   :  { %v351_v2 = vld [vmem:[#allocation2 + $0x600] sm:$0xff]  ;;  %822 = vmatpush.msrb.mxu2 %v603_v1 }
  0x67   :  { %v471_v3 = vld [vmem:[#allocation2 + $0x9c0] sm:$0xff]  ;;  %777 = vmatpush.msra.mxu3 %v351_v2  ;;  %v2459_v2 = vld.sshfl [vmem:[#allocation1] sm:$0xff pattern:$0x73625140] }
  0x68   :  { %v535_v4 = vld [vmem:[#allocation2 + $0xbc0] sm:$0xff]  ;;  %783 = vmatpush.msrb.mxu0 %v471_v3 }
  0x69   :  { %v599_v5 = vld [vmem:[#allocation2 + $0xdc0] sm:$0xff]  ;;  %803 = vmatpush.msrb.mxu1 %v535_v4  ;;  %v2464_v4 = vld.sshfl [vmem:[#allocation1 + $0x18] sm:$0xff pattern:$0x73625140]  ;;  %718 = vmatmul.f32.vlgmr.msra.gmra.mxu0 %v2459_v2 }
  0x6a   :  { %v667_v6 = vld [vmem:[#allocation2 + $0xfe0] sm:$0xff]  ;;  %823 = vmatpush.msrb.mxu2 %v599_v5  ;;  %v220_v5 = vld [vmem:[#allocation2 + $0x1e8] sm:$0xff]  ;;  %778 = vmatmul.f32.vlgmr.msra.gmra.mxu3 %v2464_v4 }
  0x6b   :  { %v467_v7 = vld [vmem:[#allocation2 + $0x9a0] sm:$0xff]  ;;  %842 = vmatpush.msrb.mxu3 %v667_v6  ;;  %v284_v6 = vld [vmem:[#allocation2 + $0x3e8] sm:$0xff] }
  0x6c   :  { %v531_v8 = vld [vmem:[#allocation2 + $0xba0] sm:$0xff]  ;;  %784 = vmatpush.msrb.mxu0 %v467_v7  ;;  %v348_v7 = vld [vmem:[#allocation2 + $0x5e8] sm:$0xff] }
  0x6d   :  { %v595_v9 = vld [vmem:[#allocation2 + $0xda0] sm:$0xff]  ;;  %804 = vmatpush.msrb.mxu1 %v531_v8 }
  0x6e   :  { %v663_v10 = vld [vmem:[#allocation2 + $0xfc0] sm:$0xff]  ;;  %824 = vmatpush.msrb.mxu2 %v595_v9  ;;  %v216_v9 = vld [vmem:[#allocation2 + $0x1c8] sm:$0xff] }
  0x6f   :  { %v463_v11 = vld [vmem:[#allocation2 + $0x980] sm:$0xff]  ;;  %843 = vmatpush.msrb.mxu3 %v663_v10  ;;  %v280_v10 = vld [vmem:[#allocation2 + $0x3c8] sm:$0xff] }
  0x70   :  { %v527_v12 = vld [vmem:[#allocation2 + $0xb80] sm:$0xff]  ;;  %785 = vmatpush.msrb.mxu0 %v463_v11  ;;  %v344_v11 = vld [vmem:[#allocation2 + $0x5c8] sm:$0xff] }
  0x71   :  { %v591_v13 = vld [vmem:[#allocation2 + $0xd80] sm:$0xff]  ;;  %805 = vmatpush.msrb.mxu1 %v527_v12  ;;  %v412_v12 = vld [vmem:[#allocation2 + $0x7e8] sm:$0xff] }
  0x72   :  { %v659_v14 = vld [vmem:[#allocation2 + $0xfa0] sm:$0xff]  ;;  %825 = vmatpush.msrb.mxu2 %v591_v13  ;;  %v212_v13 = vld [vmem:[#allocation2 + $0x1a8] sm:$0xff] }
  0x73   :  { %v459_v15 = vld [vmem:[#allocation2 + $0x960] sm:$0xff]  ;;  %844 = vmatpush.msrb.mxu3 %v659_v14  ;;  %v276_v14 = vld [vmem:[#allocation2 + $0x3a8] sm:$0xff] }
  0x74   :  { %v523_v16 = vld [vmem:[#allocation2 + $0xb60] sm:$0xff]  ;;  %786 = vmatpush.msrb.mxu0 %v459_v15  ;;  %v340_v15 = vld [vmem:[#allocation2 + $0x5a8] sm:$0xff] }
  0x75   :  { %v587_v17 = vld [vmem:[#allocation2 + $0xd60] sm:$0xff]  ;;  %806 = vmatpush.msrb.mxu1 %v523_v16  ;;  %v408_v16 = vld [vmem:[#allocation2 + $0x7c8] sm:$0xff] }
  0x76   :  { %v655_v18 = vld [vmem:[#allocation2 + $0xf80] sm:$0xff]  ;;  %826 = vmatpush.msrb.mxu2 %v587_v17 }
  0x77   :  { %v455_v19 = vld [vmem:[#allocation2 + $0x940] sm:$0xff]  ;;  %845 = vmatpush.msrb.mxu3 %v655_v18  ;;  %v208_v18 = vld [vmem:[#allocation2 + $0x188] sm:$0xff] }
  0x78   :  { %v519_v20 = vld [vmem:[#allocation2 + $0xb40] sm:$0xff]  ;;  %787 = vmatpush.msrb.mxu0 %v455_v19  ;;  %v272_v19 = vld [vmem:[#allocation2 + $0x388] sm:$0xff] }
  0x79   :  { %v583_v21 = vld [vmem:[#allocation2 + $0xd40] sm:$0xff]  ;;  %807 = vmatpush.msrb.mxu1 %v519_v20  ;;  %v336_v20 = vld [vmem:[#allocation2 + $0x588] sm:$0xff] }
  0x7a   :  { %v651_v22 = vld [vmem:[#allocation2 + $0xf60] sm:$0xff]  ;;  %827 = vmatpush.msrb.mxu2 %v583_v21  ;;  %v404_v21 = vld [vmem:[#allocation2 + $0x7a8] sm:$0xff] }
  0x7b   :  { %v451_v24 = vld [vmem:[#allocation2 + $0x920] sm:$0xff]  ;;  %846 = vmatpush.msrb.mxu3 %v651_v22 }
  0x7c   :  { %v515_v25 = vld [vmem:[#allocation2 + $0xb20] sm:$0xff]  ;;  %788 = vmatpush.msrb.mxu0 %v451_v24  ;;  %v204_v24 = vld [vmem:[#allocation2 + $0x168] sm:$0xff] }
  0x7d   :  { %v579_v26 = vld [vmem:[#allocation2 + $0xd20] sm:$0xff]  ;;  %808 = vmatpush.msrb.mxu1 %v515_v25  ;;  %v268_v25 = vld [vmem:[#allocation2 + $0x368] sm:$0xff] }
  0x7e   :  { %v647_v27 = vld [vmem:[#allocation2 + $0xf40] sm:$0xff]  ;;  %828 = vmatpush.msrb.mxu2 %v579_v26  ;;  %v332_v26 = vld [vmem:[#allocation2 + $0x568] sm:$0xff] }
  0x7f   :  { %v447_v28 = vld [vmem:[#allocation2 + $0x900] sm:$0xff]  ;;  %847 = vmatpush.msrb.mxu3 %v647_v27  ;;  %v400_v27 = vld [vmem:[#allocation2 + $0x788] sm:$0xff] }
  0x80   :  { %v511_v29 = vld [vmem:[#allocation2 + $0xb00] sm:$0xff]  ;;  %789 = vmatpush.msrb.mxu0 %v447_v28 }
  0x81   :  { %v575_v30 = vld [vmem:[#allocation2 + $0xd00] sm:$0xff]  ;;  %809 = vmatpush.msrb.mxu1 %v511_v29  ;;  %v200_v29 = vld [vmem:[#allocation2 + $0x148] sm:$0xff] }
  0x82   :  { %v643_v31 = vld [vmem:[#allocation2 + $0xf20] sm:$0xff]  ;;  %829 = vmatpush.msrb.mxu2 %v575_v30  ;;  %v264_v30 = vld [vmem:[#allocation2 + $0x348] sm:$0xff] }
  0x83   :  { %v443_v32 = vld [vmem:[#allocation2 + $0x8e0] sm:$0xff]  ;;  %848 = vmatpush.msrb.mxu3 %v643_v31  ;;  %v328_v31 = vld [vmem:[#allocation2 + $0x548] sm:$0xff] }
  0x84   :  { %v507_v33 = vld [vmem:[#allocation2 + $0xae0] sm:$0xff]  ;;  %790 = vmatpush.msrb.mxu0 %v443_v32  ;;  %v396_v32 = vld [vmem:[#allocation2 + $0x768] sm:$0xff] }
  0x85   :  { %v158_v34 = vld [vmem:[%s2777_s0 + $0x8] sm:$0xff]  ;;  %810 = vmatpush.msrb.mxu1 %v507_v33  ;;  %v196_v33 = vld [vmem:[#allocation2 + $0x128] sm:$0xff] }
  0x86   :  { %v571_v35 = vld [vmem:[#allocation2 + $0xce0] sm:$0xff]  ;;  %685 = vst [vmem:[#allocation1 + $0x20] ss:$4 sm:$0xff] %v158_v34  ;;  %v260_v34 = vld [vmem:[#allocation2 + $0x328] sm:$0xff] }
  0x87   :  { %v639_v36 = vld [vmem:[#allocation2 + $0xf00] sm:$0xff]  ;;  %830 = vmatpush.msrb.mxu2 %v571_v35  ;;  %v324_v35 = vld [vmem:[#allocation2 + $0x528] sm:$0xff] }
  0x88   :  { %v439_v37 = vld [vmem:[#allocation2 + $0x8c0] sm:$0xff]  ;;  %849 = vmatpush.msrb.mxu3 %v639_v36  ;;  %v392_v36 = vld [vmem:[#allocation2 + $0x748] sm:$0xff] }
  0x89   :  { %v503_v38 = vld [vmem:[#allocation2 + $0xac0] sm:$0xff]  ;;  %791 = vmatpush.msrb.mxu0 %v439_v37  ;;  %v192_v37 = vld [vmem:[#allocation2 + $0x108] sm:$0xff] }
  0x8a   :  { %v567_v39 = vld [vmem:[#allocation2 + $0xcc0] sm:$0xff]  ;;  %811 = vmatpush.msrb.mxu1 %v503_v38  ;;  %v256_v38 = vld [vmem:[#allocation2 + $0x308] sm:$0xff] }
  0x8b   :  { %v635_v40 = vld [vmem:[#allocation2 + $0xee0] sm:$0xff]  ;;  %831 = vmatpush.msrb.mxu2 %v567_v39  ;;  %v320_v39 = vld [vmem:[#allocation2 + $0x508] sm:$0xff] }
  0x8c   :  { %v435_v41 = vld [vmem:[#allocation2 + $0x8a0] sm:$0xff]  ;;  %850 = vmatpush.msrb.mxu3 %v635_v40  ;;  %v388_v40 = vld [vmem:[#allocation2 + $0x728] sm:$0xff] }
  0x8d   :  { %v499_v42 = vld [vmem:[#allocation2 + $0xaa0] sm:$0xff]  ;;  %792 = vmatpush.msrb.mxu0 %v435_v41  ;;  %v2469_v17 = vld.sshfl [vmem:[#allocation1 + $0x30] sm:$0xff pattern:$0x73625140] }
  0x8e   :  { %v563_v43 = vld [vmem:[#allocation2 + $0xca0] sm:$0xff]  ;;  %812 = vmatpush.msrb.mxu1 %v499_v42  ;;  %v2471_v22 = vld.sshfl [vmem:[#allocation1 + $0x20] sm:$0xff pattern:$0x73625140]  ;;  %v188_v41 = vld [vmem:[#allocation2 + $0xe8] sm:$0xff] }
  0x8f   :  { %v631_v44 = vld [vmem:[#allocation2 + $0xec0] sm:$0xff]  ;;  %832 = vmatpush.msrb.mxu2 %v563_v43  ;;  %v2474_v23 = vld.sshfl [vmem:[#allocation1 + $0x38] sm:$0xff pattern:$0x73625140]  ;;  %v252_v42 = vld [vmem:[#allocation2 + $0x2e8] sm:$0xff] }
  0x90   :  { %v431_v45 = vld [vmem:[#allocation2 + $0x880] sm:$0xff]  ;;  %851 = vmatpush.msrb.mxu3 %v631_v44  ;;  %v316_v43 = vld [vmem:[#allocation2 + $0x4e8] sm:$0xff] }
  0x91   :  { %v495_v46 = vld [vmem:[#allocation2 + $0xa80] sm:$0xff]  ;;  %793 = vmatpush.msrb.mxu0 %v431_v45  ;;  %v384_v44 = vld [vmem:[#allocation2 + $0x708] sm:$0xff] }
  0x92   :  { %v559_v47 = vld [vmem:[#allocation2 + $0xc80] sm:$0xff]  ;;  %813 = vmatpush.msrb.mxu1 %v495_v46  ;;  %v184_v45 = vld [vmem:[#allocation2 + $0xc8] sm:$0xff] }
  0x93   :  { %v627_v48 = vld [vmem:[#allocation2 + $0xea0] sm:$0xff]  ;;  %833 = vmatpush.msrb.mxu2 %v559_v47  ;;  %v248_v46 = vld [vmem:[#allocation2 + $0x2c8] sm:$0xff] }
  0x94   :  { %v427_v49 = vld [vmem:[#allocation2 + $0x860] sm:$0xff]  ;;  %852 = vmatpush.msrb.mxu3 %v627_v48  ;;  %v312_v47 = vld [vmem:[#allocation2 + $0x4c8] sm:$0xff] }
  0x95   :  { %v491_v50 = vld [vmem:[#allocation2 + $0xa60] sm:$0xff]  ;;  %794 = vmatpush.msrb.mxu0 %v427_v49  ;;  %v380_v48 = vld [vmem:[#allocation2 + $0x6e8] sm:$0xff] }
  0x96   :  { %v555_v51 = vld [vmem:[#allocation2 + $0xc60] sm:$0xff]  ;;  %814 = vmatpush.msrb.mxu1 %v491_v50  ;;  %v180_v49 = vld [vmem:[#allocation2 + $0xa8] sm:$0xff] }
  0x97   :  { %v623_v52 = vld [vmem:[#allocation2 + $0xe80] sm:$0xff]  ;;  %834 = vmatpush.msrb.mxu2 %v555_v51  ;;  %v244_v50 = vld [vmem:[#allocation2 + $0x2a8] sm:$0xff] }
  0x98   :  { %v423_v53 = vld [vmem:[#allocation2 + $0x840] sm:$0xff]  ;;  %853 = vmatpush.msrb.mxu3 %v623_v52  ;;  %v308_v51 = vld [vmem:[#allocation2 + $0x4a8] sm:$0xff] }
  0x99   :  { %v487_v54 = vld [vmem:[#allocation2 + $0xa40] sm:$0xff]  ;;  %795 = vmatpush.msrb.mxu0 %v423_v53  ;;  %v376_v52 = vld [vmem:[#allocation2 + $0x6c8] sm:$0xff] }
  0x9a   :  { %v551_v55 = vld [vmem:[#allocation2 + $0xc40] sm:$0xff]  ;;  %815 = vmatpush.msrb.mxu1 %v487_v54  ;;  %v176_v53 = vld [vmem:[#allocation2 + $0x88] sm:$0xff] }
  0x9b   :  { %v619_v56 = vld [vmem:[#allocation2 + $0xe60] sm:$0xff]  ;;  %835 = vmatpush.msrb.mxu2 %v551_v55  ;;  %v240_v54 = vld [vmem:[#allocation2 + $0x288] sm:$0xff] }
  0x9c   :  { %v419_v57 = vld [vmem:[#allocation2 + $0x820] sm:$0xff]  ;;  %854 = vmatpush.msrb.mxu3 %v619_v56  ;;  %v304_v55 = vld [vmem:[#allocation2 + $0x488] sm:$0xff] }
  0x9d   :  { %v483_v58 = vld [vmem:[#allocation2 + $0xa20] sm:$0xff]  ;;  %796 = vmatpush.msrb.mxu0 %v419_v57  ;;  %v372_v56 = vld [vmem:[#allocation2 + $0x6a8] sm:$0xff] }
  0x9e   :  { %v547_v59 = vld [vmem:[#allocation2 + $0xc20] sm:$0xff]  ;;  %816 = vmatpush.msrb.mxu1 %v483_v58  ;;  %v172_v57 = vld [vmem:[#allocation2 + $0x68] sm:$0xff] }
  0x9f   :  { %v615_v60 = vld [vmem:[#allocation2 + $0xe40] sm:$0xff]  ;;  %836 = vmatpush.msrb.mxu2 %v547_v59  ;;  %v236_v58 = vld [vmem:[#allocation2 + $0x268] sm:$0xff] }
  0xa0   :  { %v415_v62 = vld [vmem:[#allocation2 + $0x800] sm:$0xff]  ;;  %855 = vmatpush.msrb.mxu3 %v615_v60  ;;  %v300_v59 = vld [vmem:[#allocation2 + $0x468] sm:$0xff] }
  0xa1   :  { %v479_v63 = vld [vmem:[#allocation2 + $0xa00] sm:$0xff]  ;;  %797 = vmatpush.msrb.mxu0 %v415_v62  ;;  %v368_v60 = vld [vmem:[#allocation2 + $0x688] sm:$0xff] }
  0xa2   :  { %v543_v0 = vld [vmem:[#allocation2 + $0xc00] sm:$0xff]  ;;  %817 = vmatpush.msrb.mxu1 %v479_v63  ;;  %798 = vmatmul.f32.vlgmr.msrb.gmra.mxu0 %v2471_v22  ;;  %v168_v62 = vld [vmem:[#allocation2 + $0x48] sm:$0xff] }
  0xa3   :  { %v611_v1 = vld [vmem:[#allocation2 + $0xe20] sm:$0xff]  ;;  %837 = vmatpush.msrb.mxu2 %v543_v0  ;;  %862 = vmatpush.msra.mxu0 %v220_v5  ;;  %v232_v63 = vld [vmem:[#allocation2 + $0x248] sm:$0xff] }
  0xa4   :  { %v2462_v3 = vld.sshfl [vmem:[#allocation1 + $0x8] sm:$0xff pattern:$0x73625140]  ;;  %856 = vmatpush.msrb.mxu3 %v611_v1  ;;  %838 = vmatmul.f32.vlgmr.msrb.gmra.mxu2 %v2469_v17  ;;  %v296_v0 = vld [vmem:[#allocation2 + $0x448] sm:$0xff] }
  0xa5   :  { %v607_v8 = vld [vmem:[#allocation2 + $0xe00] sm:$0xff]  ;;  %738 = vmatmul.f32.vlgmr.msra.gmra.mxu1 %v2462_v3  ;;  %902 = vmatpush.msra.mxu2 %v348_v7  ;;  %v364_v1 = vld [vmem:[#allocation2 + $0x668] sm:$0xff] }
  0xa6   :  { %882 = vmatpush.msra.mxu1 %v284_v6  ;;  %857 = vmatpush.msrb.mxu3 %v607_v8  ;;  %v2477_v28 = vld.sshfl [vmem:[#allocation1 + $0x28] sm:$0xff pattern:$0x73625140]  ;;  %v164_v5 = vld [vmem:[#allocation2 + $0x28] sm:$0xff] }
  0xa7   :  { %863 = vmatpush.msra.mxu0 %v216_v9  ;;  %903 = vmatpush.msra.mxu2 %v344_v11  ;;  %v228_v6 = vld [vmem:[#allocation2 + $0x228] sm:$0xff] }
  0xa8   :  { %883 = vmatpush.msra.mxu1 %v280_v10  ;;  %922 = vmatpush.msra.mxu3 %v412_v12  ;;  %v292_v7 = vld [vmem:[#allocation2 + $0x428] sm:$0xff] }
  0xa9   :  { %864 = vmatpush.msra.mxu0 %v212_v13  ;;  %904 = vmatpush.msra.mxu2 %v340_v15  ;;  %v360_v8 = vld [vmem:[#allocation2 + $0x648] sm:$0xff] }
  0xaa   :  { %884 = vmatpush.msra.mxu1 %v276_v14  ;;  %923 = vmatpush.msra.mxu3 %v408_v16  ;;  %v160_v9 = vld [vmem:[#allocation2 + $0x8] sm:$0xff] }
  0xab   :  { %865 = vmatpush.msra.mxu0 %v208_v18  ;;  %905 = vmatpush.msra.mxu2 %v336_v20  ;;  %v224_v10 = vld [vmem:[#allocation2 + $0x208] sm:$0xff] }
  0xac   :  { %885 = vmatpush.msra.mxu1 %v272_v19  ;;  %924 = vmatpush.msra.mxu3 %v404_v21  ;;  %v288_v11 = vld [vmem:[#allocation2 + $0x408] sm:$0xff] }
  0xad   :  { %858 = vmatmul.f32.vlgmr.msrb.gmra.mxu3 %v2474_v23  ;;  %866 = vmatpush.msra.mxu0 %v204_v24  ;;  %v356_v12 = vld [vmem:[#allocation2 + $0x628] sm:$0xff] }
  0xae   :  { %886 = vmatpush.msra.mxu1 %v268_v25  ;;  %906 = vmatpush.msra.mxu2 %v332_v26  ;;  %v476_v13 = vld [vmem:[#allocation2 + $0x9e8] sm:$0xff] }
  0xaf   :  { %925 = vmatpush.msra.mxu3 %v400_v27  ;;  %818 = vmatmul.f32.vlgmr.msrb.gmra.mxu1 %v2477_v28  ;;  %v540_v14 = vld [vmem:[#allocation2 + $0xbe8] sm:$0xff] }
  0xb0   :  { %867 = vmatpush.msra.mxu0 %v200_v29  ;;  %887 = vmatpush.msra.mxu1 %v264_v30  ;;  %v604_v15 = vld [vmem:[#allocation2 + $0xde8] sm:$0xff] }
  0xb1   :  { %907 = vmatpush.msra.mxu2 %v328_v31  ;;  %926 = vmatpush.msra.mxu3 %v396_v32  ;;  %v352_v16 = vld [vmem:[#allocation2 + $0x608] sm:$0xff] }
  0xb2   :  { %868 = vmatpush.msra.mxu0 %v196_v33  ;;  %888 = vmatpush.msra.mxu1 %v260_v34  ;;  %v472_v18 = vld [vmem:[#allocation2 + $0x9c8] sm:$0xff] }
  0xb3   :  { %908 = vmatpush.msra.mxu2 %v324_v35  ;;  %927 = vmatpush.msra.mxu3 %v392_v36  ;;  %v536_v19 = vld [vmem:[#allocation2 + $0xbc8] sm:$0xff] }
  0xb4   :  { %869 = vmatpush.msra.mxu0 %v192_v37  ;;  %889 = vmatpush.msra.mxu1 %v256_v38  ;;  %v600_v20 = vld [vmem:[#allocation2 + $0xdc8] sm:$0xff] }
  0xb5   :  { %909 = vmatpush.msra.mxu2 %v320_v39  ;;  %928 = vmatpush.msra.mxu3 %v388_v40  ;;  %v668_v21 = vld [vmem:[#allocation2 + $0xfe8] sm:$0xff] }
  0xb6   :  { %870 = vmatpush.msra.mxu0 %v188_v41  ;;  %890 = vmatpush.msra.mxu1 %v252_v42  ;;  %v468_v24 = vld [vmem:[#allocation2 + $0x9a8] sm:$0xff] }
  0xb7   :  { %910 = vmatpush.msra.mxu2 %v316_v43  ;;  %929 = vmatpush.msra.mxu3 %v384_v44  ;;  %v532_v25 = vld [vmem:[#allocation2 + $0xba8] sm:$0xff] }
  0xb8   :  { %871 = vmatpush.msra.mxu0 %v184_v45  ;;  %891 = vmatpush.msra.mxu1 %v248_v46  ;;  %v596_v26 = vld [vmem:[#allocation2 + $0xda8] sm:$0xff] }
  0xb9   :  { %911 = vmatpush.msra.mxu2 %v312_v47  ;;  %930 = vmatpush.msra.mxu3 %v380_v48  ;;  %v664_v27 = vld [vmem:[#allocation2 + $0xfc8] sm:$0xff] }
  0xba   :  { %872 = vmatpush.msra.mxu0 %v180_v49  ;;  %892 = vmatpush.msra.mxu1 %v244_v50  ;;  %v464_v29 = vld [vmem:[#allocation2 + $0x988] sm:$0xff] }
  0xbb   :  { %912 = vmatpush.msra.mxu2 %v308_v51  ;;  %931 = vmatpush.msra.mxu3 %v376_v52  ;;  %v528_v30 = vld [vmem:[#allocation2 + $0xb88] sm:$0xff] }
  0xbc   :  { %873 = vmatpush.msra.mxu0 %v176_v53  ;;  %893 = vmatpush.msra.mxu1 %v240_v54  ;;  %v592_v31 = vld [vmem:[#allocation2 + $0xd88] sm:$0xff] }
  0xbd   :  { %913 = vmatpush.msra.mxu2 %v304_v55  ;;  %932 = vmatpush.msra.mxu3 %v372_v56  ;;  %v660_v32 = vld [vmem:[#allocation2 + $0xfa8] sm:$0xff] }
  0xbe   :  { %874 = vmatpush.msra.mxu0 %v172_v57  ;;  %894 = vmatpush.msra.mxu1 %v236_v58  ;;  %v460_v33 = vld [vmem:[#allocation2 + $0x968] sm:$0xff] }
  0xbf   :  { %914 = vmatpush.msra.mxu2 %v300_v59  ;;  %933 = vmatpush.msra.mxu3 %v368_v60  ;;  %v524_v34 = vld [vmem:[#allocation2 + $0xb68] sm:$0xff] }
  0xc0   :  { %875 = vmatpush.msra.mxu0 %v168_v62  ;;  %895 = vmatpush.msra.mxu1 %v232_v63  ;;  %v588_v35 = vld [vmem:[#allocation2 + $0xd68] sm:$0xff] }
  0xc1   :  { %915 = vmatpush.msra.mxu2 %v296_v0  ;;  %934 = vmatpush.msra.mxu3 %v364_v1  ;;  %v656_v36 = vld [vmem:[#allocation2 + $0xf88] sm:$0xff] }
  0xc2   :  { %876 = vmatpush.msra.mxu0 %v164_v5  ;;  %896 = vmatpush.msra.mxu1 %v228_v6  ;;  %v456_v37 = vld [vmem:[#allocation2 + $0x948] sm:$0xff] }
  0xc3   :  { %916 = vmatpush.msra.mxu2 %v292_v7  ;;  %935 = vmatpush.msra.mxu3 %v360_v8  ;;  %v520_v38 = vld [vmem:[#allocation2 + $0xb48] sm:$0xff] }
  0xc4   :  { %877 = vmatpush.msra.mxu0 %v160_v9  ;;  %897 = vmatpush.msra.mxu1 %v224_v10  ;;  %v584_v39 = vld [vmem:[#allocation2 + $0xd48] sm:$0xff] }
  0xc5   :  { %917 = vmatpush.msra.mxu2 %v288_v11  ;;  %936 = vmatpush.msra.mxu3 %v356_v12  ;;  %v652_v40 = vld [vmem:[#allocation2 + $0xf68] sm:$0xff] }
  0xc6   :  { %942 = vmatpush.msrb.mxu0 %v476_v13  ;;  %962 = vmatpush.msrb.mxu1 %v540_v14  ;;  %v452_v41 = vld [vmem:[#allocation2 + $0x928] sm:$0xff] }
  0xc7   :  { %982 = vmatpush.msrb.mxu2 %v604_v15  ;;  %937 = vmatpush.msra.mxu3 %v352_v16  ;;  %v516_v42 = vld [vmem:[#allocation2 + $0xb28] sm:$0xff] }
  0xc8   :  { %943 = vmatpush.msrb.mxu0 %v472_v18  ;;  %963 = vmatpush.msrb.mxu1 %v536_v19  ;;  %v580_v43 = vld [vmem:[#allocation2 + $0xd28] sm:$0xff] }
  0xc9   :  { %983 = vmatpush.msrb.mxu2 %v600_v20  ;;  %1002 = vmatpush.msrb.mxu3 %v668_v21  ;;  %v648_v44 = vld [vmem:[#allocation2 + $0xf48] sm:$0xff]  ;;  %v349_v21 = vld [vmem:[#allocation2 + $0x5f0] sm:$0xff] }
  0xca   :  { %944 = vmatpush.msrb.mxu0 %v468_v24  ;;  %964 = vmatpush.msrb.mxu1 %v532_v25  ;;  %v448_v45 = vld [vmem:[#allocation2 + $0x908] sm:$0xff]  ;;  %v281_v25 = vld [vmem:[#allocation2 + $0x3d0] sm:$0xff] }
  0xcb   :  { %984 = vmatpush.msrb.mxu2 %v596_v26  ;;  %1003 = vmatpush.msrb.mxu3 %v664_v27  ;;  %v512_v46 = vld [vmem:[#allocation2 + $0xb08] sm:$0xff]  ;;  %v345_v26 = vld [vmem:[#allocation2 + $0x5d0] sm:$0xff] }
  0xcc   :  { %945 = vmatpush.msrb.mxu0 %v464_v29  ;;  %965 = vmatpush.msrb.mxu1 %v528_v30  ;;  %v576_v47 = vld [vmem:[#allocation2 + $0xd08] sm:$0xff]  ;;  %v413_v27 = vld [vmem:[#allocation2 + $0x7f0] sm:$0xff] }
  0xcd   :  { %985 = vmatpush.msrb.mxu2 %v592_v31  ;;  %1004 = vmatpush.msrb.mxu3 %v660_v32  ;;  %v644_v48 = vld [vmem:[#allocation2 + $0xf28] sm:$0xff]  ;;  %v213_v29 = vld [vmem:[#allocation2 + $0x1b0] sm:$0xff] }
  0xce   :  { %946 = vmatpush.msrb.mxu0 %v460_v33  ;;  %966 = vmatpush.msrb.mxu1 %v524_v34  ;;  %v444_v49 = vld [vmem:[#allocation2 + $0x8e8] sm:$0xff]  ;;  %v277_v30 = vld [vmem:[#allocation2 + $0x3b0] sm:$0xff] }
  0xcf   :  { %986 = vmatpush.msrb.mxu2 %v588_v35  ;;  %1005 = vmatpush.msrb.mxu3 %v656_v36  ;;  %v508_v50 = vld [vmem:[#allocation2 + $0xae8] sm:$0xff]  ;;  %v341_v31 = vld [vmem:[#allocation2 + $0x5b0] sm:$0xff] }
  0xd0   :  { %947 = vmatpush.msrb.mxu0 %v456_v37  ;;  %967 = vmatpush.msrb.mxu1 %v520_v38  ;;  %v572_v51 = vld [vmem:[#allocation2 + $0xce8] sm:$0xff]  ;;  %v409_v32 = vld [vmem:[#allocation2 + $0x7d0] sm:$0xff] }
  0xd1   :  { %987 = vmatpush.msrb.mxu2 %v584_v39  ;;  %1006 = vmatpush.msrb.mxu3 %v652_v40  ;;  %v640_v52 = vld [vmem:[#allocation2 + $0xf08] sm:$0xff]  ;;  %v273_v33 = vld [vmem:[#allocation2 + $0x390] sm:$0xff] }
  0xd2   :  { %948 = vmatpush.msrb.mxu0 %v452_v41  ;;  %968 = vmatpush.msrb.mxu1 %v516_v42  ;;  %v440_v53 = vld [vmem:[#allocation2 + $0x8c8] sm:$0xff]  ;;  %v337_v34 = vld [vmem:[#allocation2 + $0x590] sm:$0xff] }
  0xd3   :  { %988 = vmatpush.msrb.mxu2 %v580_v43  ;;  %1007 = vmatpush.msrb.mxu3 %v648_v44  ;;  %v504_v54 = vld [vmem:[#allocation2 + $0xac8] sm:$0xff]  ;;  %v405_v35 = vld [vmem:[#allocation2 + $0x7b0] sm:$0xff] }
  0xd4   :  { %949 = vmatpush.msrb.mxu0 %v448_v45  ;;  %969 = vmatpush.msrb.mxu1 %v512_v46  ;;  %v568_v55 = vld [vmem:[#allocation2 + $0xcc8] sm:$0xff]  ;;  %v333_v36 = vld [vmem:[#allocation2 + $0x570] sm:$0xff] }
  0xd5   :  { %989 = vmatpush.msrb.mxu2 %v576_v47  ;;  %1008 = vmatpush.msrb.mxu3 %v644_v48  ;;  %v636_v56 = vld [vmem:[#allocation2 + $0xee8] sm:$0xff]  ;;  %v401_v37 = vld [vmem:[#allocation2 + $0x790] sm:$0xff] }
  0xd6   :  { %950 = vmatpush.msrb.mxu0 %v444_v49  ;;  %970 = vmatpush.msrb.mxu1 %v508_v50  ;;  %v436_v57 = vld [vmem:[#allocation2 + $0x8a8] sm:$0xff]  ;;  %v201_v38 = vld [vmem:[#allocation2 + $0x150] sm:$0xff] }
  0xd7   :  { %990 = vmatpush.msrb.mxu2 %v572_v51  ;;  %1009 = vmatpush.msrb.mxu3 %v640_v52  ;;  %v500_v58 = vld [vmem:[#allocation2 + $0xaa8] sm:$0xff]  ;;  %v265_v39 = vld [vmem:[#allocation2 + $0x350] sm:$0xff] }
  0xd8   :  { %951 = vmatpush.msrb.mxu0 %v440_v53  ;;  %971 = vmatpush.msrb.mxu1 %v504_v54  ;;  %v564_v59 = vld [vmem:[#allocation2 + $0xca8] sm:$0xff]  ;;  %v397_v40 = vld [vmem:[#allocation2 + $0x770] sm:$0xff] }
  0xd9   :  { %v632_v60 = vld [vmem:[#allocation2 + $0xec8] sm:$0xff]  ;;  %991 = vmatpush.msrb.mxu2 %v568_v55  ;;  %1010 = vmatpush.msrb.mxu3 %v636_v56  ;;  %v197_v41 = vld [vmem:[#allocation2 + $0x130] sm:$0xff] }
  0xda   :  { %v432_v62 = vld [vmem:[#allocation2 + $0x888] sm:$0xff]  ;;  %952 = vmatpush.msrb.mxu0 %v436_v57  ;;  %972 = vmatpush.msrb.mxu1 %v500_v58  ;;  %v261_v42 = vld [vmem:[#allocation2 + $0x330] sm:$0xff] }
  0xdb   :  { %v496_v63 = vld [vmem:[#allocation2 + $0xa88] sm:$0xff]  ;;  %992 = vmatpush.msrb.mxu2 %v564_v59  ;;  %1011 = vmatpush.msrb.mxu3 %v632_v60  ;;  %v325_v43 = vld [vmem:[#allocation2 + $0x530] sm:$0xff] }
  0xdc   :  { %v560_v0 = vld [vmem:[#allocation2 + $0xc88] sm:$0xff]  ;;  %953 = vmatpush.msrb.mxu0 %v432_v62  ;;  %973 = vmatpush.msrb.mxu1 %v496_v63  ;;  %v393_v44 = vld [vmem:[#allocation2 + $0x750] sm:$0xff] }
  0xdd   :  { %v628_v1 = vld [vmem:[#allocation2 + $0xea8] sm:$0xff]  ;;  %993 = vmatpush.msrb.mxu2 %v560_v0  ;;  %878 = vmatmul.f32.vlgmr.msra.gmra.mxu0 %v2459_v2  ;;  %v221_v2 = vld [vmem:[#allocation2 + $0x1f0] sm:$0xff] }
  0xde   :  { %v428_v5 = vld [vmem:[#allocation2 + $0x868] sm:$0xff]  ;;  %1012 = vmatpush.msrb.mxu3 %v628_v1  ;;  %918 = vmatmul.f32.vlgmr.msra.gmra.mxu2 %v2457_v61  ;;  %v193_v45 = vld [vmem:[#allocation2 + $0x110] sm:$0xff] }
  0xdf   :  { %v492_v6 = vld [vmem:[#allocation2 + $0xa68] sm:$0xff]  ;;  %954 = vmatpush.msrb.mxu0 %v428_v5  ;;  %938 = vmatmul.f32.vlgmr.msra.gmra.mxu3 %v2464_v4  ;;  %v285_v4 = vld [vmem:[#allocation2 + $0x3f0] sm:$0xff] }
  0xe0   :  { %v556_v7 = vld [vmem:[#allocation2 + $0xc68] sm:$0xff]  ;;  %974 = vmatpush.msrb.mxu1 %v492_v6  ;;  %v257_v46 = vld [vmem:[#allocation2 + $0x310] sm:$0xff] }
  0xe1   :  { %v624_v8 = vld [vmem:[#allocation2 + $0xe88] sm:$0xff]  ;;  %994 = vmatpush.msrb.mxu2 %v556_v7  ;;  %898 = vmatmul.f32.vlgmr.msra.gmra.mxu1 %v2462_v3  ;;  %v217_v3 = vld [vmem:[#allocation2 + $0x1d0] sm:$0xff] }
  0xe2   :  { %v424_v9 = vld [vmem:[#allocation2 + $0x848] sm:$0xff]  ;;  %1013 = vmatpush.msrb.mxu3 %v624_v8  ;;  %v321_v47 = vld [vmem:[#allocation2 + $0x510] sm:$0xff] }
  0xe3   :  { %v488_v10 = vld [vmem:[#allocation2 + $0xa48] sm:$0xff]  ;;  %955 = vmatpush.msrb.mxu0 %v424_v9  ;;  %v389_v48 = vld [vmem:[#allocation2 + $0x730] sm:$0xff] }
  0xe4   :  { %v552_v11 = vld [vmem:[#allocation2 + $0xc48] sm:$0xff]  ;;  %975 = vmatpush.msrb.mxu1 %v488_v10  ;;  %v189_v49 = vld [vmem:[#allocation2 + $0xf0] sm:$0xff] }
  0xe5   :  { %v620_v12 = vld [vmem:[#allocation2 + $0xe68] sm:$0xff]  ;;  %995 = vmatpush.msrb.mxu2 %v552_v11  ;;  %v253_v50 = vld [vmem:[#allocation2 + $0x2f0] sm:$0xff] }
  0xe6   :  { %v420_v13 = vld [vmem:[#allocation2 + $0x828] sm:$0xff]  ;;  %1014 = vmatpush.msrb.mxu3 %v620_v12  ;;  %v317_v51 = vld [vmem:[#allocation2 + $0x4f0] sm:$0xff] }
  0xe7   :  { %v484_v14 = vld [vmem:[#allocation2 + $0xa28] sm:$0xff]  ;;  %956 = vmatpush.msrb.mxu0 %v420_v13  ;;  %v385_v52 = vld [vmem:[#allocation2 + $0x710] sm:$0xff] }
  0xe8   :  { %v548_v15 = vld [vmem:[#allocation2 + $0xc28] sm:$0xff]  ;;  %976 = vmatpush.msrb.mxu1 %v484_v14  ;;  %v185_v53 = vld [vmem:[#allocation2 + $0xd0] sm:$0xff] }
  0xe9   :  { %v616_v16 = vld [vmem:[#allocation2 + $0xe48] sm:$0xff]  ;;  %996 = vmatpush.msrb.mxu2 %v548_v15  ;;  %v249_v54 = vld [vmem:[#allocation2 + $0x2d0] sm:$0xff] }
  0xea   :  { %v416_v61 = vld [vmem:[#allocation2 + $0x808] sm:$0xff]  ;;  %1015 = vmatpush.msrb.mxu3 %v616_v16  ;;  %v313_v55 = vld [vmem:[#allocation2 + $0x4d0] sm:$0xff] }
  0xeb   :  { %v480_v18 = vld [vmem:[#allocation2 + $0xa08] sm:$0xff]  ;;  %957 = vmatpush.msrb.mxu0 %v416_v61  ;;  %v381_v56 = vld [vmem:[#allocation2 + $0x6f0] sm:$0xff] }
  0xec   :  { %v544_v19 = vld [vmem:[#allocation2 + $0xc08] sm:$0xff]  ;;  %977 = vmatpush.msrb.mxu1 %v480_v18  ;;  %958 = vmatmul.f32.vlgmr.msrb.gmra.mxu0 %v2471_v22  ;;  %v205_v22 = vld [vmem:[#allocation2 + $0x170] sm:$0xff] }
  0xed   :  { %v612_v20 = vld [vmem:[#allocation2 + $0xe28] sm:$0xff]  ;;  %997 = vmatpush.msrb.mxu2 %v544_v19  ;;  %1022 = vmatpush.msra.mxu0 %v221_v2  ;;  %v181_v57 = vld [vmem:[#allocation2 + $0xb0] sm:$0xff] }
  0xee   :  { %1016 = vmatpush.msrb.mxu3 %v612_v20  ;;  %v608_v24 = vld [vmem:[#allocation2 + $0xe08] sm:$0xff]  ;;  %998 = vmatmul.f32.vlgmr.msrb.gmra.mxu2 %v2469_v17  ;;  %v209_v17 = vld [vmem:[#allocation2 + $0x190] sm:$0xff] }
  0xef   :  { %1042 = vmatpush.msra.mxu1 %v285_v4  ;;  %1062 = vmatpush.msra.mxu2 %v349_v21  ;;  %v245_v58 = vld [vmem:[#allocation2 + $0x2b0] sm:$0xff] }
  0xf0   :  { %1017 = vmatpush.msrb.mxu3 %v608_v24  ;;  %1023 = vmatpush.msra.mxu0 %v217_v3  ;;  %v309_v59 = vld [vmem:[#allocation2 + $0x4b0] sm:$0xff] }
  0xf1   :  { %1018 = vmatmul.f32.vlgmr.msrb.gmra.mxu3 %v2474_v23  ;;  %1043 = vmatpush.msra.mxu1 %v281_v25  ;;  %v269_v23 = vld [vmem:[#allocation2 + $0x370] sm:$0xff] }
  0xf2   :  { %1063 = vmatpush.msra.mxu2 %v345_v26  ;;  %1082 = vmatpush.msra.mxu3 %v413_v27  ;;  %v377_v60 = vld [vmem:[#allocation2 + $0x6d0] sm:$0xff] }
  0xf3   :  { %978 = vmatmul.f32.vlgmr.msrb.gmra.mxu1 %v2477_v28  ;;  %1024 = vmatpush.msra.mxu0 %v213_v29  ;;  %v329_v28 = vld [vmem:[#allocation2 + $0x550] sm:$0xff] }
  0xf4   :  { %1044 = vmatpush.msra.mxu1 %v277_v30  ;;  %1064 = vmatpush.msra.mxu2 %v341_v31  ;;  %v177_v62 = vld [vmem:[#allocation2 + $0x90] sm:$0xff] }
  0xf5   :  { %1083 = vmatpush.msra.mxu3 %v409_v32  ;;  %1025 = vmatpush.msra.mxu0 %v209_v17  ;;  %v241_v63 = vld [vmem:[#allocation2 + $0x290] sm:$0xff] }
  0xf6   :  { %1045 = vmatpush.msra.mxu1 %v273_v33  ;;  %1065 = vmatpush.msra.mxu2 %v337_v34  ;;  %v305_v0 = vld [vmem:[#allocation2 + $0x490] sm:$0xff] }
  0xf7   :  { %1084 = vmatpush.msra.mxu3 %v405_v35  ;;  %1026 = vmatpush.msra.mxu0 %v205_v22  ;;  %v373_v1 = vld [vmem:[#allocation2 + $0x6b0] sm:$0xff] }
  0xf8   :  { %1046 = vmatpush.msra.mxu1 %v269_v23  ;;  %1066 = vmatpush.msra.mxu2 %v333_v36  ;;  %v173_v5 = vld [vmem:[#allocation2 + $0x70] sm:$0xff] }
  0xf9   :  { %1085 = vmatpush.msra.mxu3 %v401_v37  ;;  %1027 = vmatpush.msra.mxu0 %v201_v38  ;;  %v237_v6 = vld [vmem:[#allocation2 + $0x270] sm:$0xff] }
  0xfa   :  { %1047 = vmatpush.msra.mxu1 %v265_v39  ;;  %1067 = vmatpush.msra.mxu2 %v329_v28  ;;  %v301_v7 = vld [vmem:[#allocation2 + $0x470] sm:$0xff] }
  0xfb   :  { %1086 = vmatpush.msra.mxu3 %v397_v40  ;;  %1028 = vmatpush.msra.mxu0 %v197_v41  ;;  %v369_v8 = vld [vmem:[#allocation2 + $0x690] sm:$0xff] }
  0xfc   :  { %1048 = vmatpush.msra.mxu1 %v261_v42  ;;  %1068 = vmatpush.msra.mxu2 %v325_v43  ;;  %v169_v9 = vld [vmem:[#allocation2 + $0x50] sm:$0xff] }
  0xfd   :  { %1087 = vmatpush.msra.mxu3 %v393_v44  ;;  %1029 = vmatpush.msra.mxu0 %v193_v45  ;;  %v233_v10 = vld [vmem:[#allocation2 + $0x250] sm:$0xff] }
  0xfe   :  { %1049 = vmatpush.msra.mxu1 %v257_v46  ;;  %1069 = vmatpush.msra.mxu2 %v321_v47  ;;  %v297_v11 = vld [vmem:[#allocation2 + $0x450] sm:$0xff] }
  0xff   :  { %1088 = vmatpush.msra.mxu3 %v389_v48  ;;  %1030 = vmatpush.msra.mxu0 %v189_v49  ;;  %v365_v12 = vld [vmem:[#allocation2 + $0x670] sm:$0xff] }
 0x100   :  { %1050 = vmatpush.msra.mxu1 %v253_v50  ;;  %1070 = vmatpush.msra.mxu2 %v317_v51  ;;  %v165_v13 = vld [vmem:[#allocation2 + $0x30] sm:$0xff] }
 0x101   :  { %1089 = vmatpush.msra.mxu3 %v385_v52  ;;  %1031 = vmatpush.msra.mxu0 %v185_v53  ;;  %v229_v14 = vld [vmem:[#allocation2 + $0x230] sm:$0xff] }
 0x102   :  { %1051 = vmatpush.msra.mxu1 %v249_v54  ;;  %1071 = vmatpush.msra.mxu2 %v313_v55  ;;  %v293_v15 = vld [vmem:[#allocation2 + $0x430] sm:$0xff] }
 0x103   :  { %1090 = vmatpush.msra.mxu3 %v381_v56  ;;  %1032 = vmatpush.msra.mxu0 %v181_v57  ;;  %v361_v16 = vld [vmem:[#allocation2 + $0x650] sm:$0xff] }
 0x104   :  { %1052 = vmatpush.msra.mxu1 %v245_v58  ;;  %1072 = vmatpush.msra.mxu2 %v309_v59  ;;  %v161_v61 = vld [vmem:[#allocation2 + $0x10] sm:$0xff] }
 0x105   :  { %1091 = vmatpush.msra.mxu3 %v377_v60  ;;  %1033 = vmatpush.msra.mxu0 %v177_v62  ;;  %v225_v18 = vld [vmem:[#allocation2 + $0x210] sm:$0xff] }
 0x106   :  { %1053 = vmatpush.msra.mxu1 %v241_v63  ;;  %1073 = vmatpush.msra.mxu2 %v305_v0  ;;  %v289_v19 = vld [vmem:[#allocation2 + $0x410] sm:$0xff] }
 0x107   :  { %1092 = vmatpush.msra.mxu3 %v373_v1  ;;  %1034 = vmatpush.msra.mxu0 %v173_v5  ;;  %v357_v20 = vld [vmem:[#allocation2 + $0x630] sm:$0xff] }
 0x108   :  { %1054 = vmatpush.msra.mxu1 %v237_v6  ;;  %1074 = vmatpush.msra.mxu2 %v301_v7  ;;  %v477_v2 = vld [vmem:[#allocation2 + $0x9f0] sm:$0xff] }
 0x109   :  { %1093 = vmatpush.msra.mxu3 %v369_v8  ;;  %1035 = vmatpush.msra.mxu0 %v169_v9  ;;  %v541_v4 = vld [vmem:[#allocation2 + $0xbf0] sm:$0xff]  ;;  %v2489_v9 = vld.sshfl [vmem:[#allocation1 + $0x10] sm:$0xff pattern:$0x73625140] }
 0x10a   :  { %1055 = vmatpush.msra.mxu1 %v233_v10  ;;  %1075 = vmatpush.msra.mxu2 %v297_v11  ;;  %v605_v21 = vld [vmem:[#allocation2 + $0xdf0] sm:$0xff] }
 0x10b   :  { %1094 = vmatpush.msra.mxu3 %v365_v12  ;;  %1036 = vmatpush.msra.mxu0 %v165_v13  ;;  %v353_v24 = vld [vmem:[#allocation2 + $0x610] sm:$0xff]  ;;  %v2492_v13 = vld.sshfl [vmem:[#allocation1] sm:$0xff pattern:$0x73625140] }
 0x10c   :  { %1056 = vmatpush.msra.mxu1 %v229_v14  ;;  %1076 = vmatpush.msra.mxu2 %v293_v15  ;;  %v473_v3 = vld [vmem:[#allocation2 + $0x9d0] sm:$0xff] }
 0x10d   :  { %1095 = vmatpush.msra.mxu3 %v361_v16  ;;  %1037 = vmatpush.msra.mxu0 %v161_v61  ;;  %v537_v25 = vld [vmem:[#allocation2 + $0xbd0] sm:$0xff] }
 0x10e   :  { %1057 = vmatpush.msra.mxu1 %v225_v18  ;;  %1077 = vmatpush.msra.mxu2 %v289_v19  ;;  %v601_v26 = vld [vmem:[#allocation2 + $0xdd0] sm:$0xff] }
 0x10f   :  { %1096 = vmatpush.msra.mxu3 %v357_v20  ;;  %1102 = vmatpush.msrb.mxu0 %v477_v2  ;;  %v669_v27 = vld [vmem:[#allocation2 + $0xff0] sm:$0xff]  ;;  %v2498_v20 = vld.sshfl [vmem:[#allocation1 + $0x8] sm:$0xff pattern:$0x73625140] }
 0x110   :  { %1122 = vmatpush.msrb.mxu1 %v541_v4  ;;  %1142 = vmatpush.msrb.mxu2 %v605_v21  ;;  %v469_v29 = vld [vmem:[#allocation2 + $0x9b0] sm:$0xff] }
 0x111   :  { %1097 = vmatpush.msra.mxu3 %v353_v24  ;;  %v533_v30 = vld [vmem:[#allocation2 + $0xbb0] sm:$0xff]  ;;  %1103 = vmatpush.msrb.mxu0 %v473_v3  ;;  %v222_v3 = vld [vmem:[#allocation2 + $0x1f8] sm:$0xff] }
 0x112   :  { %1123 = vmatpush.msrb.mxu1 %v537_v25  ;;  %v597_v31 = vld [vmem:[#allocation2 + $0xdb0] sm:$0xff]  ;;  %1143 = vmatpush.msrb.mxu2 %v601_v26  ;;  %v286_v25 = vld [vmem:[#allocation2 + $0x3f8] sm:$0xff] }
 0x113   :  { %v665_v32 = vld [vmem:[#allocation2 + $0xfd0] sm:$0xff]  ;;  %1162 = vmatpush.msrb.mxu3 %v669_v27  ;;  %1104 = vmatpush.msrb.mxu0 %v469_v29  ;;  %v350_v26 = vld [vmem:[#allocation2 + $0x5f8] sm:$0xff]  ;;  %v2501_v29 = vld.sshfl [vmem:[#allocation1 + $0x30] sm:$0xff pattern:$0x73625140] }
 0x114   :  { %v465_v17 = vld [vmem:[#allocation2 + $0x990] sm:$0xff]  ;;  %1124 = vmatpush.msrb.mxu1 %v533_v30  ;;  %1144 = vmatpush.msrb.mxu2 %v597_v31  ;;  %v218_v30 = vld [vmem:[#allocation2 + $0x1d8] sm:$0xff] }
 0x115   :  { %v529_v33 = vld [vmem:[#allocation2 + $0xb90] sm:$0xff]  ;;  %1163 = vmatpush.msrb.mxu3 %v665_v32  ;;  %1105 = vmatpush.msrb.mxu0 %v465_v17  ;;  %v282_v31 = vld [vmem:[#allocation2 + $0x3d8] sm:$0xff] }
 0x116   :  { %v593_v34 = vld [vmem:[#allocation2 + $0xd90] sm:$0xff]  ;;  %1125 = vmatpush.msrb.mxu1 %v529_v33  ;;  %1078 = vmatmul.f32.vlgmr.msra.gmra.mxu2 %v2489_v9  ;;  %v346_v32 = vld [vmem:[#allocation2 + $0x5d8] sm:$0xff] }
 0x117   :  { %v661_v35 = vld [vmem:[#allocation2 + $0xfb0] sm:$0xff]  ;;  %1145 = vmatpush.msrb.mxu2 %v593_v34  ;;  %1038 = vmatmul.f32.vlgmr.msra.gmra.mxu0 %v2492_v13  ;;  %v2504_v17 = vld.sshfl [vmem:[#allocation1 + $0x20] sm:$0xff pattern:$0x73625140] }
 0x118   :  { %v461_v22 = vld [vmem:[#allocation2 + $0x970] sm:$0xff]  ;;  %1164 = vmatpush.msrb.mxu3 %v661_v35  ;;  %1058 = vmatmul.f32.vlgmr.msra.gmra.mxu1 %v2498_v20  ;;  %v414_v33 = vld [vmem:[#allocation2 + $0x7f8] sm:$0xff] }
 0x119   :  { %v525_v23 = vld [vmem:[#allocation2 + $0xb70] sm:$0xff]  ;;  %1106 = vmatpush.msrb.mxu0 %v461_v22  ;;  %v214_v35 = vld [vmem:[#allocation2 + $0x1b8] sm:$0xff] }
 0x11a   :  { %v589_v36 = vld [vmem:[#allocation2 + $0xd70] sm:$0xff]  ;;  %1126 = vmatpush.msrb.mxu1 %v525_v23  ;;  %v278_v22 = vld [vmem:[#allocation2 + $0x3b8] sm:$0xff] }
 0x11b   :  { %v657_v37 = vld [vmem:[#allocation2 + $0xf90] sm:$0xff]  ;;  %1146 = vmatpush.msrb.mxu2 %v589_v36  ;;  %v342_v23 = vld [vmem:[#allocation2 + $0x5b8] sm:$0xff] }
 0x11c   :  { %v457_v38 = vld [vmem:[#allocation2 + $0x950] sm:$0xff]  ;;  %1165 = vmatpush.msrb.mxu3 %v657_v37  ;;  %v410_v36 = vld [vmem:[#allocation2 + $0x7d8] sm:$0xff]  ;;  %v2510_v37 = vld.sshfl [vmem:[#allocation1 + $0x28] sm:$0xff pattern:$0x73625140] }
 0x11d   :  { %v521_v39 = vld [vmem:[#allocation2 + $0xb50] sm:$0xff]  ;;  %1107 = vmatpush.msrb.mxu0 %v457_v38  ;;  %v210_v38 = vld [vmem:[#allocation2 + $0x198] sm:$0xff] }
 0x11e   :  { %v585_v28 = vld [vmem:[#allocation2 + $0xd50] sm:$0xff]  ;;  %1127 = vmatpush.msrb.mxu1 %v521_v39  ;;  %v274_v39 = vld [vmem:[#allocation2 + $0x398] sm:$0xff] }
 0x11f   :  { %v653_v40 = vld [vmem:[#allocation2 + $0xf70] sm:$0xff]  ;;  %1147 = vmatpush.msrb.mxu2 %v585_v28  ;;  %v338_v28 = vld [vmem:[#allocation2 + $0x598] sm:$0xff] }
 0x120   :  { %v453_v41 = vld [vmem:[#allocation2 + $0x930] sm:$0xff]  ;;  %1166 = vmatpush.msrb.mxu3 %v653_v40  ;;  %v406_v40 = vld [vmem:[#allocation2 + $0x7b8] sm:$0xff] }
 0x121   :  { %v517_v42 = vld [vmem:[#allocation2 + $0xb30] sm:$0xff]  ;;  %1108 = vmatpush.msrb.mxu0 %v453_v41  ;;  %v206_v41 = vld [vmem:[#allocation2 + $0x178] sm:$0xff] }
 0x122   :  { %v581_v43 = vld [vmem:[#allocation2 + $0xd30] sm:$0xff]  ;;  %1128 = vmatpush.msrb.mxu1 %v517_v42  ;;  %v270_v42 = vld [vmem:[#allocation2 + $0x378] sm:$0xff] }
 0x123   :  { %v649_v44 = vld [vmem:[#allocation2 + $0xf50] sm:$0xff]  ;;  %1148 = vmatpush.msrb.mxu2 %v581_v43  ;;  %v334_v43 = vld [vmem:[#allocation2 + $0x578] sm:$0xff] }
 0x124   :  { %v449_v45 = vld [vmem:[#allocation2 + $0x910] sm:$0xff]  ;;  %1167 = vmatpush.msrb.mxu3 %v649_v44  ;;  %v402_v44 = vld [vmem:[#allocation2 + $0x798] sm:$0xff] }
 0x125   :  { %v513_v46 = vld [vmem:[#allocation2 + $0xb10] sm:$0xff]  ;;  %1109 = vmatpush.msrb.mxu0 %v449_v45  ;;  %v202_v45 = vld [vmem:[#allocation2 + $0x158] sm:$0xff] }
 0x126   :  { %v577_v47 = vld [vmem:[#allocation2 + $0xd10] sm:$0xff]  ;;  %1129 = vmatpush.msrb.mxu1 %v513_v46  ;;  %v266_v46 = vld [vmem:[#allocation2 + $0x358] sm:$0xff] }
 0x127   :  { %v645_v48 = vld [vmem:[#allocation2 + $0xf30] sm:$0xff]  ;;  %1149 = vmatpush.msrb.mxu2 %v577_v47  ;;  %v330_v47 = vld [vmem:[#allocation2 + $0x558] sm:$0xff] }
 0x128   :  { %v445_v49 = vld [vmem:[#allocation2 + $0x8f0] sm:$0xff]  ;;  %1168 = vmatpush.msrb.mxu3 %v645_v48  ;;  %v398_v48 = vld [vmem:[#allocation2 + $0x778] sm:$0xff] }
 0x129   :  { %v509_v50 = vld [vmem:[#allocation2 + $0xaf0] sm:$0xff]  ;;  %1110 = vmatpush.msrb.mxu0 %v445_v49  ;;  %v198_v49 = vld [vmem:[#allocation2 + $0x138] sm:$0xff] }
 0x12a   :  { %v573_v51 = vld [vmem:[#allocation2 + $0xcf0] sm:$0xff]  ;;  %1130 = vmatpush.msrb.mxu1 %v509_v50  ;;  %v262_v50 = vld [vmem:[#allocation2 + $0x338] sm:$0xff] }
 0x12b   :  { %v641_v52 = vld [vmem:[#allocation2 + $0xf10] sm:$0xff]  ;;  %1150 = vmatpush.msrb.mxu2 %v573_v51  ;;  %v326_v51 = vld [vmem:[#allocation2 + $0x538] sm:$0xff] }
 0x12c   :  { %v441_v53 = vld [vmem:[#allocation2 + $0x8d0] sm:$0xff]  ;;  %1169 = vmatpush.msrb.mxu3 %v641_v52  ;;  %v394_v52 = vld [vmem:[#allocation2 + $0x758] sm:$0xff] }
 0x12d   :  { %v505_v54 = vld [vmem:[#allocation2 + $0xad0] sm:$0xff]  ;;  %1111 = vmatpush.msrb.mxu0 %v441_v53  ;;  %v194_v53 = vld [vmem:[#allocation2 + $0x118] sm:$0xff] }
 0x12e   :  { %v569_v55 = vld [vmem:[#allocation2 + $0xcd0] sm:$0xff]  ;;  %1131 = vmatpush.msrb.mxu1 %v505_v54  ;;  %v258_v54 = vld [vmem:[#allocation2 + $0x318] sm:$0xff] }
 0x12f   :  { %v637_v56 = vld [vmem:[#allocation2 + $0xef0] sm:$0xff]  ;;  %1151 = vmatpush.msrb.mxu2 %v569_v55  ;;  %v322_v55 = vld [vmem:[#allocation2 + $0x518] sm:$0xff] }
 0x130   :  { %v437_v57 = vld [vmem:[#allocation2 + $0x8b0] sm:$0xff]  ;;  %1170 = vmatpush.msrb.mxu3 %v637_v56  ;;  %v390_v56 = vld [vmem:[#allocation2 + $0x738] sm:$0xff] }
 0x131   :  { %v501_v58 = vld [vmem:[#allocation2 + $0xab0] sm:$0xff]  ;;  %1112 = vmatpush.msrb.mxu0 %v437_v57  ;;  %v190_v57 = vld [vmem:[#allocation2 + $0xf8] sm:$0xff] }
 0x132   :  { %v565_v59 = vld [vmem:[#allocation2 + $0xcb0] sm:$0xff]  ;;  %1132 = vmatpush.msrb.mxu1 %v501_v58  ;;  %v254_v58 = vld [vmem:[#allocation2 + $0x2f8] sm:$0xff] }
 0x133   :  { %v633_v60 = vld [vmem:[#allocation2 + $0xed0] sm:$0xff]  ;;  %1152 = vmatpush.msrb.mxu2 %v565_v59  ;;  %v318_v59 = vld [vmem:[#allocation2 + $0x4f8] sm:$0xff] }
 0x134   :  { %v433_v62 = vld [vmem:[#allocation2 + $0x890] sm:$0xff]  ;;  %1171 = vmatpush.msrb.mxu3 %v633_v60  ;;  %v386_v60 = vld [vmem:[#allocation2 + $0x718] sm:$0xff] }
 0x135   :  { %v497_v63 = vld [vmem:[#allocation2 + $0xa90] sm:$0xff]  ;;  %1113 = vmatpush.msrb.mxu0 %v433_v62  ;;  %v186_v62 = vld [vmem:[#allocation2 + $0xd8] sm:$0xff] }
 0x136   :  { %v561_v0 = vld [vmem:[#allocation2 + $0xc90] sm:$0xff]  ;;  %1133 = vmatpush.msrb.mxu1 %v497_v63  ;;  %v250_v63 = vld [vmem:[#allocation2 + $0x2d8] sm:$0xff] }
 0x137   :  { %v629_v1 = vld [vmem:[#allocation2 + $0xeb0] sm:$0xff]  ;;  %1153 = vmatpush.msrb.mxu2 %v561_v0  ;;  %v314_v0 = vld [vmem:[#allocation2 + $0x4d8] sm:$0xff] }
 0x138   :  { %v429_v5 = vld [vmem:[#allocation2 + $0x870] sm:$0xff]  ;;  %1172 = vmatpush.msrb.mxu3 %v629_v1  ;;  %v382_v1 = vld [vmem:[#allocation2 + $0x6f8] sm:$0xff] }
 0x139   :  { %v493_v6 = vld [vmem:[#allocation2 + $0xa70] sm:$0xff]  ;;  %1114 = vmatpush.msrb.mxu0 %v429_v5  ;;  %v182_v5 = vld [vmem:[#allocation2 + $0xb8] sm:$0xff] }
 0x13a   :  { %v557_v7 = vld [vmem:[#allocation2 + $0xc70] sm:$0xff]  ;;  %1134 = vmatpush.msrb.mxu1 %v493_v6  ;;  %v246_v6 = vld [vmem:[#allocation2 + $0x2b8] sm:$0xff] }
 0x13b   :  { %v625_v8 = vld [vmem:[#allocation2 + $0xe90] sm:$0xff]  ;;  %1154 = vmatpush.msrb.mxu2 %v557_v7  ;;  %v310_v7 = vld [vmem:[#allocation2 + $0x4b8] sm:$0xff] }
 0x13c   :  { %v425_v10 = vld [vmem:[#allocation2 + $0x850] sm:$0xff]  ;;  %1173 = vmatpush.msrb.mxu3 %v625_v8  ;;  %v378_v8 = vld [vmem:[#allocation2 + $0x6d8] sm:$0xff] }
 0x13d   :  { %v489_v11 = vld [vmem:[#allocation2 + $0xa50] sm:$0xff]  ;;  %1115 = vmatpush.msrb.mxu0 %v425_v10  ;;  %v178_v10 = vld [vmem:[#allocation2 + $0x98] sm:$0xff] }
 0x13e   :  { %v553_v12 = vld [vmem:[#allocation2 + $0xc50] sm:$0xff]  ;;  %1135 = vmatpush.msrb.mxu1 %v489_v11  ;;  %v242_v11 = vld [vmem:[#allocation2 + $0x298] sm:$0xff] }
 0x13f   :  { %v621_v14 = vld [vmem:[#allocation2 + $0xe70] sm:$0xff]  ;;  %1155 = vmatpush.msrb.mxu2 %v553_v12  ;;  %v306_v12 = vld [vmem:[#allocation2 + $0x498] sm:$0xff] }
 0x140   :  { %v2495_v15 = vld.sshfl [vmem:[#allocation1 + $0x18] sm:$0xff pattern:$0x73625140]  ;;  %1174 = vmatpush.msrb.mxu3 %v621_v14  ;;  %v374_v14 = vld [vmem:[#allocation2 + $0x6b8] sm:$0xff] }
 0x141   :  { %1098 = vmatmul.f32.vlgmr.msra.gmra.mxu3 %v2495_v15  ;;  %v421_v16 = vld [vmem:[#allocation2 + $0x830] sm:$0xff] }
 0x142   :  { %v485_v61 = vld [vmem:[#allocation2 + $0xa30] sm:$0xff]  ;;  %1116 = vmatpush.msrb.mxu0 %v421_v16  ;;  %v174_v16 = vld [vmem:[#allocation2 + $0x78] sm:$0xff] }
 0x143   :  { %v549_v18 = vld [vmem:[#allocation2 + $0xc30] sm:$0xff]  ;;  %1136 = vmatpush.msrb.mxu1 %v485_v61  ;;  %v238_v61 = vld [vmem:[#allocation2 + $0x278] sm:$0xff] }
 0x144   :  { %v617_v19 = vld [vmem:[#allocation2 + $0xe50] sm:$0xff]  ;;  %1156 = vmatpush.msrb.mxu2 %v549_v18  ;;  %v302_v18 = vld [vmem:[#allocation2 + $0x478] sm:$0xff] }
 0x145   :  { %v417_v2 = vld [vmem:[#allocation2 + $0x810] sm:$0xff]  ;;  %1175 = vmatpush.msrb.mxu3 %v617_v19  ;;  %v370_v19 = vld [vmem:[#allocation2 + $0x698] sm:$0xff] }
 0x146   :  { %v481_v4 = vld [vmem:[#allocation2 + $0xa10] sm:$0xff]  ;;  %1117 = vmatpush.msrb.mxu0 %v417_v2  ;;  %v170_v2 = vld [vmem:[#allocation2 + $0x58] sm:$0xff] }
 0x147   :  { %v545_v21 = vld [vmem:[#allocation2 + $0xc10] sm:$0xff]  ;;  %1137 = vmatpush.msrb.mxu1 %v481_v4  ;;  %1118 = vmatmul.f32.vlgmr.msrb.gmra.mxu0 %v2504_v17  ;;  %v234_v4 = vld [vmem:[#allocation2 + $0x258] sm:$0xff] }
 0x148   :  { %v613_v24 = vld [vmem:[#allocation2 + $0xe30] sm:$0xff]  ;;  %1157 = vmatpush.msrb.mxu2 %v545_v21  ;;  %1182 = vmatpush.msra.mxu0 %v222_v3  ;;  %v298_v21 = vld [vmem:[#allocation2 + $0x458] sm:$0xff] }
 0x149   :  { %1176 = vmatpush.msrb.mxu3 %v613_v24  ;;  %v609_v27 = vld [vmem:[#allocation2 + $0xe10] sm:$0xff]  ;;  %1158 = vmatmul.f32.vlgmr.msrb.gmra.mxu2 %v2501_v29  ;;  %v366_v24 = vld [vmem:[#allocation2 + $0x678] sm:$0xff] }
 0x14a   :  { %1202 = vmatpush.msra.mxu1 %v286_v25  ;;  %1222 = vmatpush.msra.mxu2 %v350_v26  ;;  %v2507_v34 = vld.sshfl [vmem:[#allocation1 + $0x38] sm:$0xff pattern:$0x73625140]  ;;  %v166_v3 = vld [vmem:[#allocation2 + $0x38] sm:$0xff] }
 0x14b   :  { %1177 = vmatpush.msrb.mxu3 %v609_v27  ;;  %1183 = vmatpush.msra.mxu0 %v218_v30  ;;  %v230_v25 = vld [vmem:[#allocation2 + $0x238] sm:$0xff] }
 0x14c   :  { %1178 = vmatmul.f32.vlgmr.msrb.gmra.mxu3 %v2507_v34  ;;  %1203 = vmatpush.msra.mxu1 %v282_v31  ;;  %v294_v26 = vld [vmem:[#allocation2 + $0x438] sm:$0xff] }
 0x14d   :  { %1223 = vmatpush.msra.mxu2 %v346_v32  ;;  %1242 = vmatpush.msra.mxu3 %v414_v33  ;;  %v362_v27 = vld [vmem:[#allocation2 + $0x658] sm:$0xff]  ;;  %v2513_v32 = vld [vmem:[#allocation5] sm:$0xf] }
 0x14e   :  { %1138 = vmatmul.f32.vlgmr.msrb.gmra.mxu1 %v2510_v37  ;;  %1184 = vmatpush.msra.mxu0 %v214_v35  ;;  %v162_v30 = vld [vmem:[#allocation2 + $0x18] sm:$0xff] }
 0x14f   :  { %1204 = vmatpush.msra.mxu1 %v278_v22  ;;  %1224 = vmatpush.msra.mxu2 %v342_v23  ;;  %v226_v31 = vld [vmem:[#allocation2 + $0x218] sm:$0xff]  ;;  %v719_v22 = vpop.f32.mrf.mxu0 }
 0x150   :  { %1243 = vmatpush.msra.mxu3 %v410_v36  ;;  %1185 = vmatpush.msra.mxu0 %v210_v38  ;;  %v290_v33 = vld [vmem:[#allocation2 + $0x418] sm:$0xff] }
 0x151   :  { %1205 = vmatpush.msra.mxu1 %v274_v39  ;;  %1225 = vmatpush.msra.mxu2 %v338_v28  ;;  %v358_v35 = vld [vmem:[#allocation2 + $0x638] sm:$0xff]  ;;  %v673_v28 = vperm.slane %v2513_v32, 0 }
 0x152   :  { %1244 = vmatpush.msra.mxu3 %v406_v40  ;;  %1186 = vmatpush.msra.mxu0 %v206_v41  ;;  %v478_v23 = vld [vmem:[#allocation2 + $0x9f8] sm:$0xff] }
 0x153   :  { %1206 = vmatpush.msra.mxu1 %v270_v42  ;;  %1226 = vmatpush.msra.mxu2 %v334_v43  ;;  %v542_v36 = vld [vmem:[#allocation2 + $0xbf8] sm:$0xff]  ;;  %v739_v42 = vpop.f32.mrf.mxu1 }
 0x154   :  { %1245 = vmatpush.msra.mxu3 %v402_v44  ;;  %1187 = vmatpush.msra.mxu0 %v202_v45  ;;  %v606_v38 = vld [vmem:[#allocation2 + $0xdf8] sm:$0xff]  ;;  %v759_v45 = vpop.f32.mrf.mxu2 }
 0x155   :  { %1207 = vmatpush.msra.mxu1 %v266_v46  ;;  %1227 = vmatpush.msra.mxu2 %v330_v47  ;;  %v354_v39 = vld [vmem:[#allocation2 + $0x618] sm:$0xff] }
 0x156   :  { %1246 = vmatpush.msra.mxu3 %v398_v48  ;;  %1188 = vmatpush.msra.mxu0 %v198_v49  ;;  %v474_v40 = vld [vmem:[#allocation2 + $0x9d8] sm:$0xff] }
 0x157   :  { %1208 = vmatpush.msra.mxu1 %v262_v50  ;;  %1228 = vmatpush.msra.mxu2 %v326_v51  ;;  %v538_v41 = vld [vmem:[#allocation2 + $0xbd8] sm:$0xff]  ;;  %v720_v50 = vadd.f32 %v719_v22, %v673_v28 }
 0x158   :  { %1247 = vmatpush.msra.mxu3 %v394_v52  ;;  %1189 = vmatpush.msra.mxu0 %v194_v53  ;;  %v602_v43 = vld [vmem:[#allocation2 + $0xdd8] sm:$0xff]  ;;  %v779_v53 = vpop.f32.mrf.mxu3 }
 0x159   :  { %1209 = vmatpush.msra.mxu1 %v258_v54  ;;  %1229 = vmatpush.msra.mxu2 %v322_v55  ;;  %v670_v44 = vld [vmem:[#allocation2 + $0xff8] sm:$0xff] }
 0x15a   :  { %1248 = vmatpush.msra.mxu3 %v390_v56  ;;  %1190 = vmatpush.msra.mxu0 %v190_v57  ;;  %v470_v46 = vld [vmem:[#allocation2 + $0x9b8] sm:$0xff] }
 0x15b   :  { %1210 = vmatpush.msra.mxu1 %v254_v58  ;;  %1230 = vmatpush.msra.mxu2 %v318_v59  ;;  %v534_v47 = vld [vmem:[#allocation2 + $0xbb8] sm:$0xff] }
 0x15c   :  { %1249 = vmatpush.msra.mxu3 %v386_v60  ;;  %1191 = vmatpush.msra.mxu0 %v186_v62  ;;  %v598_v48 = vld [vmem:[#allocation2 + $0xdb8] sm:$0xff]  ;;  %v740_v60 = vadd.f32 %v739_v42, %v720_v50  ;;  %v799_v62 = vpop.f32.mrf.mxu0 }
 0x15d   :  { %1211 = vmatpush.msra.mxu1 %v250_v63  ;;  %1231 = vmatpush.msra.mxu2 %v314_v0  ;;  %v666_v49 = vld [vmem:[#allocation2 + $0xfd8] sm:$0xff] }
 0x15e   :  { %1250 = vmatpush.msra.mxu3 %v382_v1  ;;  %1192 = vmatpush.msra.mxu0 %v182_v5  ;;  %v466_v51 = vld [vmem:[#allocation2 + $0x998] sm:$0xff] }
 0x15f   :  { %1212 = vmatpush.msra.mxu1 %v246_v6  ;;  %1232 = vmatpush.msra.mxu2 %v310_v7  ;;  %v530_v52 = vld [vmem:[#allocation2 + $0xb98] sm:$0xff] }
 0x160   :  { %1251 = vmatpush.msra.mxu3 %v378_v8  ;;  %1193 = vmatpush.msra.mxu0 %v178_v10  ;;  %v594_v54 = vld [vmem:[#allocation2 + $0xd98] sm:$0xff]  ;;  %v2516_v8 = vpop.f32.mrf.mxu1 }
 0x161   :  { %1213 = vmatpush.msra.mxu1 %v242_v11  ;;  %1233 = vmatpush.msra.mxu2 %v306_v12  ;;  %v662_v55 = vld [vmem:[#allocation2 + $0xfb8] sm:$0xff]  ;;  %v760_v12 = vadd.f32 %v759_v45, %v740_v60 }
 0x162   :  { %1252 = vmatpush.msra.mxu3 %v374_v14  ;;  %1194 = vmatpush.msra.mxu0 %v174_v16  ;;  %v462_v56 = vld [vmem:[#allocation2 + $0x978] sm:$0xff]  ;;  %v2518_v14 = vpop.f32.mrf.mxu2 }
 0x163   :  { %1214 = vmatpush.msra.mxu1 %v238_v61  ;;  %1234 = vmatpush.msra.mxu2 %v302_v18  ;;  %v526_v57 = vld [vmem:[#allocation2 + $0xb78] sm:$0xff] }
 0x164   :  { %1253 = vmatpush.msra.mxu3 %v370_v19  ;;  %1195 = vmatpush.msra.mxu0 %v170_v2  ;;  %v590_v58 = vld [vmem:[#allocation2 + $0xd78] sm:$0xff]  ;;  %v674_v2 = vperm.slane %v2513_v32, 1 }
 0x165   :  { %1215 = vmatpush.msra.mxu1 %v234_v4  ;;  %1235 = vmatpush.msra.mxu2 %v298_v21  ;;  %v658_v59 = vld [vmem:[#allocation2 + $0xf98] sm:$0xff] }
 0x166   :  { %1254 = vmatpush.msra.mxu3 %v366_v24  ;;  %1196 = vmatpush.msra.mxu0 %v166_v3  ;;  %v458_v63 = vld [vmem:[#allocation2 + $0x958] sm:$0xff]  ;;  %v2521_v24 = vpop.f32.mrf.mxu3 }
 0x167   :  { %1216 = vmatpush.msra.mxu1 %v230_v25  ;;  %1236 = vmatpush.msra.mxu2 %v294_v26  ;;  %v522_v0 = vld [vmem:[#allocation2 + $0xb58] sm:$0xff]  ;;  %v780_v26 = vadd.f32 %v779_v53, %v760_v12 }
 0x168   :  { %1255 = vmatpush.msra.mxu3 %v362_v27  ;;  %1197 = vmatpush.msra.mxu0 %v162_v30  ;;  %v586_v1 = vld [vmem:[#allocation2 + $0xd58] sm:$0xff]  ;;  %v899_v28 = vpop.f32.mrf.mxu1 }
 0x169   :  { %1217 = vmatpush.msra.mxu1 %v226_v31  ;;  %1237 = vmatpush.msra.mxu2 %v290_v33  ;;  %v654_v5 = vld [vmem:[#allocation2 + $0xf78] sm:$0xff]  ;;  %v879_v31 = vpop.f32.mrf.mxu0 }
 0x16a   :  { %1256 = vmatpush.msra.mxu3 %v358_v35  ;;  %1262 = vmatpush.msrb.mxu0 %v478_v23  ;;  %v454_v6 = vld [vmem:[#allocation2 + $0x938] sm:$0xff]  ;;  %v880_v22 = vadd.f32 %v879_v31, %v674_v2  ;;  %v1429_v2 = vld [vmem:[#allocation7 + $0x1e0] sm:$0xff] }
 0x16b   :  { %1282 = vmatpush.msrb.mxu1 %v542_v36  ;;  %1302 = vmatpush.msrb.mxu2 %v606_v38  ;;  %v518_v7 = vld [vmem:[#allocation2 + $0xb38] sm:$0xff] }
 0x16c   :  { %1257 = vmatpush.msra.mxu3 %v354_v39  ;;  %1263 = vmatpush.msrb.mxu0 %v474_v40  ;;  %v582_v10 = vld [vmem:[#allocation2 + $0xd38] sm:$0xff]  ;;  %v800_v40 = vadd.f32 %v799_v62, %v780_v26  ;;  %v1461_v26 = vld [vmem:[#allocation7 + $0x2e0] sm:$0xff] }
 0x16d   :  { %1283 = vmatpush.msrb.mxu1 %v538_v41  ;;  %1303 = vmatpush.msrb.mxu2 %v602_v43  ;;  %v650_v11 = vld [vmem:[#allocation2 + $0xf58] sm:$0xff]  ;;  %v900_v43 = vadd.f32 %v899_v28, %v880_v22 }
 0x16e   :  { %1322 = vmatpush.msrb.mxu3 %v670_v44  ;;  %1264 = vmatpush.msrb.mxu0 %v470_v46  ;;  %v450_v16 = vld [vmem:[#allocation2 + $0x918] sm:$0xff]  ;;  %v919_v44 = vpop.f32.mrf.mxu2 }
 0x16f   :  { %1284 = vmatpush.msrb.mxu1 %v534_v47  ;;  %1304 = vmatpush.msrb.mxu2 %v598_v48  ;;  %v514_v61 = vld [vmem:[#allocation2 + $0xb18] sm:$0xff]  ;;  %v920_v48 = vadd.f32 %v919_v44, %v900_v43 }
 0x170   :  { %1323 = vmatpush.msrb.mxu3 %v666_v49  ;;  %1265 = vmatpush.msrb.mxu0 %v466_v51  ;;  %v578_v18 = vld [vmem:[#allocation2 + $0xd18] sm:$0xff]  ;;  %v939_v51 = vpop.f32.mrf.mxu3 }
 0x171   :  { %1285 = vmatpush.msrb.mxu1 %v530_v52  ;;  %1305 = vmatpush.msrb.mxu2 %v594_v54  ;;  %v646_v19 = vld [vmem:[#allocation2 + $0xf38] sm:$0xff]  ;;  %v820_v52 = vadd.f32 %v2516_v8, %v800_v40  ;;  %v940_v54 = vadd.f32 %v939_v51, %v920_v48  ;;  %v1453_v40 = vld [vmem:[#allocation7 + $0x2a0] sm:$0xff] }
 0x172   :  { %1324 = vmatpush.msrb.mxu3 %v662_v55  ;;  %1266 = vmatpush.msrb.mxu0 %v462_v56  ;;  %v446_v4 = vld [vmem:[#allocation2 + $0x8f8] sm:$0xff]  ;;  %v1413_v48 = vld [vmem:[#allocation7 + $0x160] sm:$0xff] }
 0x173   :  { %1286 = vmatpush.msrb.mxu1 %v526_v57  ;;  %1306 = vmatpush.msrb.mxu2 %v590_v58  ;;  %v510_v21 = vld [vmem:[#allocation2 + $0xaf8] sm:$0xff]  ;;  %v959_v58 = vpop.f32.mrf.mxu0  ;;  %v840_v62 = vadd.f32 %v2518_v14, %v820_v52  ;;  %v1445_v52 = vld [vmem:[#allocation7 + $0x260] sm:$0xff] }
 0x174   :  { %1325 = vmatpush.msrb.mxu3 %v658_v59  ;;  %1267 = vmatpush.msrb.mxu0 %v458_v63  ;;  %v574_v3 = vld [vmem:[#allocation2 + $0xcf8] sm:$0xff]  ;;  %v960_v60 = vadd.f32 %v959_v58, %v940_v54  ;;  %v1409_v54 = vld [vmem:[#allocation7 + $0x140] sm:$0xff] }
 0x175   :  { %1287 = vmatpush.msrb.mxu1 %v522_v0  ;;  %1307 = vmatpush.msrb.mxu2 %v586_v1  ;;  %v642_v25 = vld [vmem:[#allocation2 + $0xf18] sm:$0xff]  ;;  %v1441_v58 = vld [vmem:[#allocation7 + $0x240] sm:$0xff] }
 0x176   :  { %1326 = vmatpush.msrb.mxu3 %v654_v5  ;;  %1268 = vmatpush.msrb.mxu0 %v454_v6  ;;  %v442_v27 = vld [vmem:[#allocation2 + $0x8d8] sm:$0xff]  ;;  %v979_v5 = vpop.f32.mrf.mxu1  ;;  %v999_v8 = vpop.f32.mrf.mxu2 }
 0x177   :  { %1288 = vmatpush.msrb.mxu1 %v518_v7  ;;  %1308 = vmatpush.msrb.mxu2 %v582_v10  ;;  %v506_v30 = vld [vmem:[#allocation2 + $0xad8] sm:$0xff] }
 0x178   :  { %1327 = vmatpush.msrb.mxu3 %v650_v11  ;;  %1269 = vmatpush.msrb.mxu0 %v450_v16  ;;  %v570_v33 = vld [vmem:[#allocation2 + $0xcd8] sm:$0xff] }
 0x179   :  { %1289 = vmatpush.msrb.mxu1 %v514_v61  ;;  %1309 = vmatpush.msrb.mxu2 %v578_v18  ;;  %v638_v35 = vld [vmem:[#allocation2 + $0xef8] sm:$0xff]  ;;  %v1019_v18 = vpop.f32.mrf.mxu3 }
 0x17a   :  { %1328 = vmatpush.msrb.mxu3 %v646_v19  ;;  %1270 = vmatpush.msrb.mxu0 %v446_v4  ;;  %v438_v23 = vld [vmem:[#allocation2 + $0x8b8] sm:$0xff]  ;;  %v1397_v19 = vld [vmem:[#allocation7 + $0xe0] sm:$0xff] }
 0x17b   :  { %1290 = vmatpush.msrb.mxu1 %v510_v21  ;;  %1310 = vmatpush.msrb.mxu2 %v574_v3  ;;  %v502_v36 = vld [vmem:[#allocation2 + $0xab8] sm:$0xff] }
 0x17c   :  { %1329 = vmatpush.msrb.mxu3 %v642_v25  ;;  %1271 = vmatpush.msrb.mxu0 %v442_v27  ;;  %v566_v38 = vld [vmem:[#allocation2 + $0xcb8] sm:$0xff]  ;;  %v1393_v27 = vld [vmem:[#allocation7 + $0xc0] sm:$0xff] }
 0x17d   :  { %1291 = vmatpush.msrb.mxu1 %v506_v30  ;;  %v634_v39 = vld [vmem:[#allocation2 + $0xed8] sm:$0xff]  ;;  %1311 = vmatpush.msrb.mxu2 %v570_v33  ;;  %v1425_v30 = vld [vmem:[#allocation7 + $0x1c0] sm:$0xff] }
 0x17e   :  { %1330 = vmatpush.msrb.mxu3 %v638_v35  ;;  %v434_v41 = vld [vmem:[#allocation2 + $0x898] sm:$0xff]  ;;  %1272 = vmatpush.msrb.mxu0 %v438_v23  ;;  %v1389_v23 = vld [vmem:[#allocation7 + $0xa0] sm:$0xff] }
 0x17f   :  { %v498_v42 = vld [vmem:[#allocation2 + $0xa98] sm:$0xff]  ;;  %1292 = vmatpush.msrb.mxu1 %v502_v36  ;;  %1312 = vmatpush.msrb.mxu2 %v566_v38  ;;  %v1421_v36 = vld [vmem:[#allocation7 + $0x1a0] sm:$0xff] }
 0x180   :  { %v562_v45 = vld [vmem:[#allocation2 + $0xc98] sm:$0xff]  ;;  %1331 = vmatpush.msrb.mxu3 %v634_v39  ;;  %1273 = vmatpush.msrb.mxu0 %v434_v41  ;;  %v1385_v41 = vld [vmem:[#allocation7 + $0x80] sm:$0xff] }
 0x181   :  { %v630_v46 = vld [vmem:[#allocation2 + $0xeb8] sm:$0xff]  ;;  %1293 = vmatpush.msrb.mxu1 %v498_v42  ;;  %1313 = vmatpush.msrb.mxu2 %v562_v45  ;;  %v1417_v42 = vld [vmem:[#allocation7 + $0x180] sm:$0xff] }
 0x182   :  { %v430_v47 = vld [vmem:[#allocation2 + $0x878] sm:$0xff]  ;;  %1332 = vmatpush.msrb.mxu3 %v630_v46  ;;  %1238 = vmatmul.f32.vlgmr.msra.gmra.mxu2 %v2489_v9  ;;  %v1449_v46 = vld [vmem:[#allocation7 + $0x280] sm:$0xff] }
 0x183   :  { %v494_v49 = vld [vmem:[#allocation2 + $0xa78] sm:$0xff]  ;;  %1274 = vmatpush.msrb.mxu0 %v430_v47  ;;  %1258 = vmatmul.f32.vlgmr.msra.gmra.mxu3 %v2495_v15  ;;  %v860_v15 = vadd.f32 %v2521_v24, %v840_v62  ;;  %v1381_v47 = vld [vmem:[#allocation7 + $0x60] sm:$0xff] }
 0x184   :  { %v558_v50 = vld [vmem:[#allocation2 + $0xc78] sm:$0xff]  ;;  %1294 = vmatpush.msrb.mxu1 %v494_v49  ;;  %1198 = vmatmul.f32.vlgmr.msra.gmra.mxu0 %v2492_v13  ;;  %v980_v13 = vadd.f32 %v979_v5, %v960_v60  ;;  %v1405_v60 = vld [vmem:[#allocation7 + $0x120] sm:$0xff] }
 0x185   :  { %v626_v53 = vld [vmem:[#allocation2 + $0xe98] sm:$0xff]  ;;  %1314 = vmatpush.msrb.mxu2 %v558_v50  ;;  %1218 = vmatmul.f32.vlgmr.msra.gmra.mxu1 %v2498_v20  ;;  %v1346_v4 = vmul.f32 0.2, %v860_v15  ;;  %vm1342_vm1 = vcmp.ge.f32.partialorder %v860_v15, 0.0  ;;  %v1401_v5 = vld [vmem:[#allocation7 + $0x100] sm:$0xff] }
 0x186   :  { %v426_v55 = vld [vmem:[#allocation2 + $0x858] sm:$0xff]  ;;  %1333 = vmatpush.msrb.mxu3 %v626_v53  ;;  %v1000_v14 = vadd.f32 %v999_v8, %v980_v13  ;;  %v1377_v53 = vld [vmem:[#allocation7 + $0x40] sm:$0xff]  ;;  %v1398_v8 = vld [vmem:[#allocation7 + $0xe8] sm:$0xff] }
 0x187   :  { %v490_v56 = vld [vmem:[#allocation2 + $0xa58] sm:$0xff]  ;;  %1275 = vmatpush.msrb.mxu0 %v426_v55 }
 0x188   :  { %v554_v57 = vld [vmem:[#allocation2 + $0xc58] sm:$0xff]  ;;  %1295 = vmatpush.msrb.mxu1 %v490_v56  ;;  %v1020_v20 = vadd.f32 %v1019_v18, %v1000_v14  ;;  %v1462_v18 = vld [vmem:[#allocation7 + $0x2e8] sm:$0xff] }
 0x189   :  { %v622_v59 = vld [vmem:[#allocation2 + $0xe78] sm:$0xff]  ;;  %1315 = vmatpush.msrb.mxu2 %v554_v57 }
 0x18a   :  { %v422_v63 = vld [vmem:[#allocation2 + $0x838] sm:$0xff]  ;;  %1334 = vmatpush.msrb.mxu3 %v622_v59  ;;  %vm1343_vm0 = vcmp.ge.f32.partialorder %v1020_v20, 0.0  ;;  %v1347_v21 = vmul.f32 0.2, %v1020_v20  ;;  %v1373_v59 = vld [vmem:[#allocation7 + $0x20] sm:$0xff] }
 0x18b   :  { %v486_v0 = vld [vmem:[#allocation2 + $0xa38] sm:$0xff]  ;;  %1276 = vmatpush.msrb.mxu0 %v422_v63 }
 0x18c   :  { %v550_v9 = vld [vmem:[#allocation2 + $0xc38] sm:$0xff]  ;;  %1296 = vmatpush.msrb.mxu1 %v486_v0 }
 0x18d   :  { %v618_v1 = vld [vmem:[#allocation2 + $0xe58] sm:$0xff]  ;;  %1316 = vmatpush.msrb.mxu2 %v550_v9  ;;  %v1437_v9 = vld [vmem:[#allocation7 + $0x220] sm:$0xff] }
 0x18e   :  { %v418_v6 = vld [vmem:[#allocation2 + $0x818] sm:$0xff]  ;;  %1335 = vmatpush.msrb.mxu3 %v618_v1  ;;  %v1369_v1 = vld [vmem:[#allocation7] sm:$0xff] }
 0x18f   :  { %v482_v7 = vld [vmem:[#allocation2 + $0xa18] sm:$0xff]  ;;  %1277 = vmatpush.msrb.mxu0 %v418_v6 }
 0x190   :  { %v546_v10 = vld [vmem:[#allocation2 + $0xc18] sm:$0xff]  ;;  %1297 = vmatpush.msrb.mxu1 %v482_v7  ;;  %1278 = vmatmul.f32.vlgmr.msrb.gmra.mxu0 %v2504_v17 }
 0x191   :  { %v614_v11 = vld [vmem:[#allocation2 + $0xe38] sm:$0xff]  ;;  %1317 = vmatpush.msrb.mxu2 %v546_v10  ;;  %1298 = vmatmul.f32.vlgmr.msrb.gmra.mxu1 %v2510_v37  ;;  %v1457_v37 = vld [vmem:[#allocation7 + $0x2c0] sm:$0xff]  ;;  %v1430_v10 = vld [vmem:[#allocation7 + $0x1e8] sm:$0xff] }
 0x192   :  { %v1399_v12 = vld [vmem:[#allocation7 + $0xf0] sm:$0xff]  ;;  %1336 = vmatpush.msrb.mxu3 %v614_v11  ;;  %1318 = vmatmul.f32.vlgmr.msrb.gmra.mxu2 %v2501_v29  ;;  %v2533_v29 = vsel %vm1343_vm0, %v1020_v20, %v1347_v21  ;;  %v1400_v6 = vld [vmem:[#allocation7 + $0xf8] sm:$0xff]  ;;  %v1433_v11 = vld [vmem:[#allocation7 + $0x200] sm:$0xff] }
 0x193   :  { %v1431_v16 = vld [vmem:[#allocation7 + $0x1f0] sm:$0xff]  ;;  %1503 = vmatpush.msra.mxu0 %v1399_v12  ;;  %v1358_v31 = vrot.slane %v2533_v29, 6  ;;  %v1432_v7 = vld [vmem:[#allocation7 + $0x1f8] sm:$0xff]  ;;  %v1422_v21 = vld [vmem:[#allocation7 + $0x1a8] sm:$0xff] }
 0x194   :  { %v610_v61 = vld [vmem:[#allocation2 + $0xe18] sm:$0xff]  ;;  %1523 = vmatpush.msra.mxu1 %v1431_v16  ;;  %v1394_v16 = vld [vmem:[#allocation7 + $0xc8] sm:$0xff] }
 0x195   :  { %1337 = vmatpush.msrb.mxu3 %v610_v61  ;;  %v1463_v24 = vld [vmem:[#allocation7 + $0x2f0] sm:$0xff]  ;;  %1504 = vmatpush.msra.mxu0 %v1397_v19  ;;  %v1428_v12 = vld [vmem:[#allocation7 + $0x1d8] sm:$0xff]  ;;  %v1426_v61 = vld [vmem:[#allocation7 + $0x1c8] sm:$0xff] }
 0x196   :  { %1338 = vmatmul.f32.vlgmr.msrb.gmra.mxu3 %v2507_v34  ;;  %v1395_v3 = vld [vmem:[#allocation7 + $0xd0] sm:$0xff]  ;;  %1524 = vmatpush.msra.mxu1 %v1429_v2  ;;  %v2538_v34 = vsel %vm1342_vm1, %v860_v15, %v1346_v4  ;;  %v1396_v15 = vld [vmem:[#allocation7 + $0xd8] sm:$0xff]  ;;  %v1390_v4 = vld [vmem:[#allocation7 + $0xa8] sm:$0xff] }
 0x197   :  { %v1427_v25 = vld [vmem:[#allocation7 + $0x1d0] sm:$0xff]  ;;  %1543 = vmatpush.msra.mxu2 %v1463_v24  ;;  %1505 = vmatpush.msra.mxu0 %v1395_v3  ;;  %v2542_v22 = vsel %vm1361_vm2, %v2538_v34, %v1358_v31  ;;  %v1464_v14 = vld [vmem:[#allocation7 + $0x2f8] sm:$0xff]  ;;  %v1458_v24 = vld [vmem:[#allocation7 + $0x2c8] sm:$0xff] }
 0x198   :  { %1525 = vmatpush.msra.mxu1 %v1427_v25  ;;  %v1459_v17 = vld [vmem:[#allocation7 + $0x2d0] sm:$0xff]  ;;  %v1392_v20 = vld [vmem:[#allocation7 + $0xb8] sm:$0xff]  ;;  %v1418_v31 = vld [vmem:[#allocation7 + $0x188] sm:$0xff] }
 0x199   :  { %v1391_v33 = vld [vmem:[#allocation7 + $0xb0] sm:$0xff]  ;;  %1544 = vmatpush.msra.mxu2 %v1461_v26  ;;  %1506 = vmatpush.msra.mxu0 %v1393_v27  ;;  %v1424_v19 = vld [vmem:[#allocation7 + $0x1b8] sm:$0xff] }
 0x19a   :  { %v1423_v35 = vld [vmem:[#allocation7 + $0x1b0] sm:$0xff]  ;;  %1526 = vmatpush.msra.mxu1 %v1425_v30  ;;  %v1460_v2 = vld [vmem:[#allocation7 + $0x2d8] sm:$0xff]  ;;  %v1386_v30 = vld [vmem:[#allocation7 + $0x88] sm:$0xff] }
 0x19b   :  { %1545 = vmatpush.msra.mxu2 %v1459_v17  ;;  %1507 = vmatpush.msra.mxu0 %v1391_v33  ;;  %v1455_v38 = vld [vmem:[#allocation7 + $0x2b0] sm:$0xff]  ;;  %v1388_v25 = vld [vmem:[#allocation7 + $0x98] sm:$0xff]  ;;  %v1454_v17 = vld [vmem:[#allocation7 + $0x2a8] sm:$0xff] }
 0x19c   :  { %1527 = vmatpush.msra.mxu1 %v1423_v35  ;;  %v1387_v39 = vld [vmem:[#allocation7 + $0x90] sm:$0xff]  ;;  %v1420_v26 = vld [vmem:[#allocation7 + $0x198] sm:$0xff] }
 0x19d   :  { %v1419_v28 = vld [vmem:[#allocation7 + $0x190] sm:$0xff]  ;;  %1546 = vmatpush.msra.mxu2 %v1457_v37  ;;  %1508 = vmatpush.msra.mxu0 %v1389_v23  ;;  %v1456_v27 = vld [vmem:[#allocation7 + $0x2b8] sm:$0xff]  ;;  %v675_v37 = vperm.slane %v2513_v32, 2 }
 0x19e   :  { %1528 = vmatpush.msra.mxu1 %v1421_v36  ;;  %v1451_v43 = vld [vmem:[#allocation7 + $0x290] sm:$0xff]  ;;  %v1384_v33 = vld [vmem:[#allocation7 + $0x78] sm:$0xff]  ;;  %v1382_v36 = vld [vmem:[#allocation7 + $0x68] sm:$0xff] }
 0x19f   :  { %1547 = vmatpush.msra.mxu2 %v1455_v38  ;;  %1509 = vmatpush.msra.mxu0 %v1387_v39  ;;  %v1383_v44 = vld [vmem:[#allocation7 + $0x70] sm:$0xff]  ;;  %v1416_v35 = vld [vmem:[#allocation7 + $0x178] sm:$0xff]  ;;  %v1414_v38 = vld [vmem:[#allocation7 + $0x168] sm:$0xff] }
 0x1a0   :  { %1529 = vmatpush.msra.mxu1 %v1419_v28  ;;  %v1415_v45 = vld [vmem:[#allocation7 + $0x170] sm:$0xff]  ;;  %v1452_v23 = vld [vmem:[#allocation7 + $0x298] sm:$0xff]  ;;  %v1493_v39 = vld [vmem:[#allocation7 + $0x3e0] sm:$0xff]  ;;  %v1039_v28 = vpop.f32.mrf.mxu0 }
 0x1a1   :  { %1548 = vmatpush.msra.mxu2 %v1453_v40  ;;  %1510 = vmatpush.msra.mxu0 %v1385_v41  ;;  %v1447_v49 = vld [vmem:[#allocation7 + $0x270] sm:$0xff]  ;;  %v1450_v40 = vld [vmem:[#allocation7 + $0x288] sm:$0xff] }
 0x1a2   :  { %1530 = vmatpush.msra.mxu1 %v1417_v42  ;;  %v1379_v50 = vld [vmem:[#allocation7 + $0x50] sm:$0xff]  ;;  %v1380_v42 = vld [vmem:[#allocation7 + $0x58] sm:$0xff] }
 0x1a3   :  { %1549 = vmatpush.msra.mxu2 %v1451_v43  ;;  %1511 = vmatpush.msra.mxu0 %v1383_v44  ;;  %v1411_v51 = vld [vmem:[#allocation7 + $0x150] sm:$0xff]  ;;  %v1412_v43 = vld [vmem:[#allocation7 + $0x158] sm:$0xff]  ;;  %v1040_v44 = vadd.f32 %v1039_v28, %v675_v37  ;;  %v1478_v28 = vld [vmem:[#allocation7 + $0x368] sm:$0xff] }
 0x1a4   :  { %1531 = vmatpush.msra.mxu1 %v1415_v45  ;;  %v1443_v55 = vld [vmem:[#allocation7 + $0x250] sm:$0xff]  ;;  %v1448_v45 = vld [vmem:[#allocation7 + $0x278] sm:$0xff] }
 0x1a5   :  { %1550 = vmatpush.msra.mxu2 %v1449_v46  ;;  %1512 = vmatpush.msra.mxu0 %v1381_v47  ;;  %v1375_v56 = vld [vmem:[#allocation7 + $0x30] sm:$0xff]  ;;  %v1489_v46 = vld [vmem:[#allocation7 + $0x3c0] sm:$0xff]  ;;  %v1378_v47 = vld [vmem:[#allocation7 + $0x48] sm:$0xff] }
 0x1a6   :  { %1532 = vmatpush.msra.mxu1 %v1413_v48  ;;  %v1407_v57 = vld [vmem:[#allocation7 + $0x130] sm:$0xff]  ;;  %v1410_v48 = vld [vmem:[#allocation7 + $0x148] sm:$0xff]  ;;  %v1488_v37 = vld [vmem:[#allocation7 + $0x3b8] sm:$0xff] }
 0x1a7   :  { %1551 = vmatpush.msra.mxu2 %v1447_v49  ;;  %1513 = vmatpush.msra.mxu0 %v1379_v50  ;;  %v1439_v62 = vld [vmem:[#allocation7 + $0x230] sm:$0xff]  ;;  %v1059_v49 = vpop.f32.mrf.mxu1 }
 0x1a8   :  { %1533 = vmatpush.msra.mxu1 %v1411_v51  ;;  %v1371_v63 = vld [vmem:[#allocation7 + $0x10] sm:$0xff]  ;;  %v1060_v50 = vadd.f32 %v1059_v49, %v1040_v44  ;;  %v1079_v51 = vpop.f32.mrf.mxu2  ;;  %v1468_v44 = vld [vmem:[#allocation7 + $0x318] sm:$0xff] }
 0x1a9   :  { %1552 = vmatpush.msra.mxu2 %v1445_v52  ;;  %1514 = vmatpush.msra.mxu0 %v1377_v53  ;;  %v1403_v0 = vld [vmem:[#allocation7 + $0x110] sm:$0xff]  ;;  %v1446_v52 = vld [vmem:[#allocation7 + $0x268] sm:$0xff] }
 0x1aa   :  { %1534 = vmatpush.msra.mxu1 %v1409_v54  ;;  %v1435_v13 = vld [vmem:[#allocation7 + $0x210] sm:$0xff]  ;;  %v1376_v54 = vld [vmem:[#allocation7 + $0x38] sm:$0xff] }
 0x1ab   :  { %1553 = vmatpush.msra.mxu2 %v1443_v55  ;;  %1515 = vmatpush.msra.mxu0 %v1375_v56  ;;  %v1495_v3 = vld [vmem:[#allocation7 + $0x3f0] sm:$0xff]  ;;  %v1408_v55 = vld [vmem:[#allocation7 + $0x138] sm:$0xff]  ;;  %v1080_v56 = vadd.f32 %v1079_v51, %v1060_v50 }
 0x1ac   :  { %1535 = vmatpush.msra.mxu1 %v1407_v57  ;;  %1563 = vmatpush.msra.mxu3 %v1495_v3  ;;  %v1491_v41 = vld [vmem:[#allocation7 + $0x3d0] sm:$0xff]  ;;  %v1444_v57 = vld [vmem:[#allocation7 + $0x258] sm:$0xff]  ;;  %v1473_v3 = vld [vmem:[#allocation7 + $0x340] sm:$0xff] }
 0x1ad   :  { %1554 = vmatpush.msra.mxu2 %v1441_v58  ;;  %1516 = vmatpush.msra.mxu0 %v1373_v59  ;;  %v1487_v53 = vld [vmem:[#allocation7 + $0x3b0] sm:$0xff]  ;;  %v1485_v58 = vld [vmem:[#allocation7 + $0x3a0] sm:$0xff]  ;;  %v1374_v59 = vld [vmem:[#allocation7 + $0x28] sm:$0xff] }
 0x1ae   :  { %1536 = vmatpush.msra.mxu1 %v1405_v60  ;;  %1564 = vmatpush.msra.mxu3 %v1493_v39  ;;  %v1406_v60 = vld [vmem:[#allocation7 + $0x128] sm:$0xff]  ;;  %v1480_v39 = vld [vmem:[#allocation7 + $0x378] sm:$0xff] }
 0x1af   :  { %1555 = vmatpush.msra.mxu2 %v1439_v62  ;;  %1517 = vmatpush.msra.mxu0 %v1371_v63 }
 0x1b0   :  { %1537 = vmatpush.msra.mxu1 %v1403_v0  ;;  %1565 = vmatpush.msra.mxu3 %v1491_v41  ;;  %v1442_v0 = vld [vmem:[#allocation7 + $0x248] sm:$0xff] }
 0x1b1   :  { %1556 = vmatpush.msra.mxu2 %v1437_v9  ;;  %1518 = vmatpush.msra.mxu0 %v1369_v1  ;;  %v1483_v9 = vld [vmem:[#allocation7 + $0x390] sm:$0xff]  ;;  %v1372_v1 = vld [vmem:[#allocation7 + $0x18] sm:$0xff]  ;;  %v1474_v41 = vld [vmem:[#allocation7 + $0x348] sm:$0xff] }
 0x1b2   :  { %1538 = vmatpush.msra.mxu1 %v1401_v5  ;;  %1519 = vmatmul.f32.vlgmr.msra.gmra.mxu0 %v2538_v34  ;;  %v1404_v5 = vld [vmem:[#allocation7 + $0x118] sm:$0xff] }
 0x1b3   :  { %1539 = vmatmul.f32.vlgmr.msra.gmra.mxu1 %v2533_v29  ;;  %1583 = vmatpush.msrb.mxu0 %v1400_v6 }
 0x1b4   :  { %1603 = vmatpush.msrb.mxu1 %v1432_v7  ;;  %1557 = vmatpush.msra.mxu2 %v1435_v13  ;;  %v1440_v7 = vld [vmem:[#allocation7 + $0x238] sm:$0xff]  ;;  %v1481_v13 = vld [vmem:[#allocation7 + $0x380] sm:$0xff] }
 0x1b5   :  { %1584 = vmatpush.msrb.mxu0 %v1398_v8  ;;  %1566 = vmatpush.msra.mxu3 %v1489_v46  ;;  %v1370_v8 = vld [vmem:[#allocation7 + $0x8] sm:$0xff]  ;;  %v676_v46 = vperm.slane %v2513_v32, 3 }
 0x1b6   :  { %1604 = vmatpush.msrb.mxu1 %v1430_v10  ;;  %1558 = vmatpush.msra.mxu2 %v1433_v11  ;;  %v1402_v10 = vld [vmem:[#allocation7 + $0x108] sm:$0xff] }
 0x1b7   :  { %1585 = vmatpush.msrb.mxu0 %v1396_v15  ;;  %1567 = vmatpush.msra.mxu3 %v1487_v53 }
 0x1b8   :  { %1605 = vmatpush.msrb.mxu1 %v1428_v12  ;;  %1623 = vmatpush.msrb.mxu2 %v1464_v14  ;;  %v1438_v12 = vld [vmem:[#allocation7 + $0x228] sm:$0xff]  ;;  %v1479_v14 = vld [vmem:[#allocation7 + $0x370] sm:$0xff] }
 0x1b9   :  { %1586 = vmatpush.msrb.mxu0 %v1394_v16  ;;  %1568 = vmatpush.msra.mxu3 %v1485_v58 }
 0x1ba   :  { %1606 = vmatpush.msrb.mxu1 %v1426_v61  ;;  %1624 = vmatpush.msrb.mxu2 %v1462_v18  ;;  %v1436_v18 = vld [vmem:[#allocation7 + $0x218] sm:$0xff] }
 0x1bb   :  { %1587 = vmatpush.msrb.mxu0 %v1392_v20  ;;  %1569 = vmatpush.msra.mxu3 %v1483_v9  ;;  %v1477_v20 = vld [vmem:[#allocation7 + $0x360] sm:$0xff] }
 0x1bc   :  { %1607 = vmatpush.msrb.mxu1 %v1424_v19  ;;  %1625 = vmatpush.msrb.mxu2 %v1460_v2 }
 0x1bd   :  { %1588 = vmatpush.msrb.mxu0 %v1390_v4  ;;  %1570 = vmatpush.msra.mxu3 %v1481_v13  ;;  %v1434_v4 = vld [vmem:[#allocation7 + $0x208] sm:$0xff] }
 0x1be   :  { %1608 = vmatpush.msrb.mxu1 %v1422_v21  ;;  %1626 = vmatpush.msrb.mxu2 %v1458_v24  ;;  %v1475_v21 = vld [vmem:[#allocation7 + $0x350] sm:$0xff]  ;;  %v1677_v13 = vld [vmem:[%s2782_s5 + $0x70] sm:$0xff] }
 0x1bf   :  { %1589 = vmatpush.msrb.mxu0 %v1388_v25  ;;  %1571 = vmatpush.msra.mxu3 %v1479_v14  ;;  %v1674_v14 = vld [vmem:[%s2782_s5 + $0x58] sm:$0xff] }
 0x1c0   :  { %1609 = vmatpush.msrb.mxu1 %v1420_v26  ;;  %1627 = vmatpush.msrb.mxu2 %v1456_v27  ;;  %v1471_v26 = vld [vmem:[#allocation7 + $0x330] sm:$0xff] }
 0x1c1   :  { %1590 = vmatpush.msrb.mxu0 %v1386_v30  ;;  %1572 = vmatpush.msra.mxu3 %v1477_v20  ;;  %v1467_v27 = vld [vmem:[#allocation7 + $0x310] sm:$0xff]  ;;  %v1465_v30 = vld [vmem:[#allocation7 + $0x300] sm:$0xff] }
 0x1c2   :  { %1610 = vmatpush.msrb.mxu1 %v1418_v31  ;;  %1628 = vmatpush.msrb.mxu2 %v1454_v17  ;;  %v1496_v31 = vld [vmem:[#allocation7 + $0x3f8] sm:$0xff]  ;;  %v1494_v17 = vld [vmem:[#allocation7 + $0x3e8] sm:$0xff] }
 0x1c3   :  { %1591 = vmatpush.msrb.mxu0 %v1384_v33  ;;  %1573 = vmatpush.msra.mxu3 %v1475_v21  ;;  %v1492_v33 = vld [vmem:[#allocation7 + $0x3d8] sm:$0xff]  ;;  %v1670_v21 = vld [vmem:[%s2782_s5 + $0x38] sm:$0xff] }
 0x1c4   :  { %1611 = vmatpush.msrb.mxu1 %v1416_v35  ;;  %1629 = vmatpush.msrb.mxu2 %v1452_v23  ;;  %v1099_v62 = vpop.f32.mrf.mxu3  ;;  %v1119_v6 = vpop.f32.mrf.mxu0  ;;  %v1490_v35 = vld [vmem:[#allocation7 + $0x3c8] sm:$0xff]  ;;  %v1672_v20 = vld [vmem:[%s2782_s5 + $0x48] sm:$0xff] }
 0x1c5   :  { %1592 = vmatpush.msrb.mxu0 %v1382_v36  ;;  %v1100_v63 = vadd.f32 %v1099_v62, %v1080_v56  ;;  %1574 = vmatpush.msra.mxu3 %v1473_v3  ;;  %v1486_v23 = vld [vmem:[#allocation7 + $0x3a8] sm:$0xff]  ;;  %v1484_v36 = vld [vmem:[#allocation7 + $0x398] sm:$0xff] }
 0x1c6   :  { %1612 = vmatpush.msrb.mxu1 %v1414_v38  ;;  %1630 = vmatpush.msrb.mxu2 %v1450_v40  ;;  %v1482_v38 = vld [vmem:[#allocation7 + $0x388] sm:$0xff]  ;;  %v1476_v40 = vld [vmem:[#allocation7 + $0x358] sm:$0xff] }
 0x1c7   :  { %1593 = vmatpush.msrb.mxu0 %v1380_v42  ;;  %v1120_v11 = vadd.f32 %v1119_v6, %v1100_v63  ;;  %1575 = vmatpush.msra.mxu3 %v1471_v26  ;;  %v1472_v42 = vld [vmem:[#allocation7 + $0x338] sm:$0xff]  ;;  %v1669_v3 = vld [vmem:[%s2782_s5 + $0x30] sm:$0xff] }
 0x1c8   :  { %1613 = vmatpush.msrb.mxu1 %v1412_v43  ;;  %1631 = vmatpush.msrb.mxu2 %v1448_v45  ;;  %v1470_v43 = vld [vmem:[#allocation7 + $0x328] sm:$0xff]  ;;  %v1668_v26 = vld [vmem:[%s2782_s5 + $0x28] sm:$0xff] }
 0x1c9   :  { %1594 = vmatpush.msrb.mxu0 %v1378_v47  ;;  %v1466_v45 = vld [vmem:[#allocation7 + $0x308] sm:$0xff] }
 0x1ca   :  { %1614 = vmatpush.msrb.mxu1 %v1410_v48  ;;  %1632 = vmatpush.msrb.mxu2 %v1446_v52 }
 0x1cb   :  { %1595 = vmatpush.msrb.mxu0 %v1376_v54  ;;  %v1139_v15 = vpop.f32.mrf.mxu1 }
 0x1cc   :  { %1615 = vmatpush.msrb.mxu1 %v1408_v55  ;;  %1633 = vmatpush.msrb.mxu2 %v1444_v57  ;;  %v1140_v16 = vadd.f32 %v1139_v15, %v1120_v11  ;;  %v1159_v61 = vpop.f32.mrf.mxu2  ;;  %v1692_v11 = vld [vmem:[%s2782_s5 + $0xe8] sm:$0xff]  ;;  %v1675_v15 = vld [vmem:[%s2782_s5 + $0x60] sm:$0xff] }
 0x1cd   :  { %1596 = vmatpush.msrb.mxu0 %v1374_v59 }
 0x1ce   :  { %1616 = vmatpush.msrb.mxu1 %v1406_v60  ;;  %1634 = vmatpush.msrb.mxu2 %v1442_v0  ;;  %v1160_v19 = vadd.f32 %v1159_v61, %v1140_v16  ;;  %v1690_v16 = vld [vmem:[%s2782_s5 + $0xd8] sm:$0xff]  ;;  %v1673_v61 = vld [vmem:[%s2782_s5 + $0x50] sm:$0xff] }
 0x1cf   :  { %1597 = vmatpush.msrb.mxu0 %v1372_v1  ;;  %v1179_v2 = vpop.f32.mrf.mxu3 }
 0x1d0   :  { %1617 = vmatpush.msrb.mxu1 %v1404_v5  ;;  %1635 = vmatpush.msrb.mxu2 %v1440_v7  ;;  %v1180_v24 = vadd.f32 %v1179_v2, %v1160_v19  ;;  %v1678_v7 = vld [vmem:[%s2782_s5 + $0x78] sm:$0xff]  ;;  %v1688_v19 = vld [vmem:[%s2782_s5 + $0xc8] sm:$0xff]  ;;  %v1671_v2 = vld [vmem:[%s2782_s5 + $0x40] sm:$0xff] }
 0x1d1   :  { %1598 = vmatpush.msrb.mxu0 %v1370_v8  ;;  %v1694_v8 = vld [vmem:[%s2782_s5 + $0xf8] sm:$0xff] }
 0x1d2   :  { %1618 = vmatpush.msrb.mxu1 %v1402_v10  ;;  %1599 = vmatmul.f32.vlgmr.msrb.gmra.mxu0 %v2538_v34  ;;  %vm1344_vm3 = vcmp.ge.f32.partialorder %v1180_v24, 0.0  ;;  %v1348_v25 = vmul.f32 0.2, %v1180_v24  ;;  %v1693_v10 = vld [vmem:[%s2782_s5 + $0xf0] sm:$0xff] }
 0x1d3   :  { %1619 = vmatmul.f32.vlgmr.msrb.gmra.mxu1 %v2533_v29  ;;  %1636 = vmatpush.msrb.mxu2 %v1438_v12  ;;  %v1469_v29 = vld [vmem:[#allocation7 + $0x320] sm:$0xff]  ;;  %v1691_v12 = vld [vmem:[%s2782_s5 + $0xe0] sm:$0xff] }
 0x1d4   :  { %v2549_v34 = vsel %vm1344_vm3, %v1180_v24, %v1348_v25  ;;  %1576 = vmatpush.msra.mxu3 %v1469_v29  ;;  %1701 = vmatpush.msra.mxu0 %v1678_v7  ;;  %v1686_v24 = vld [vmem:[%s2782_s5 + $0xb8] sm:$0xff]  ;;  %v1685_v25 = vld [vmem:[%s2782_s5 + $0xb0] sm:$0xff] }
 0x1d5   :  { %1637 = vmatpush.msrb.mxu2 %v1436_v18  ;;  %v1359_v9 = vrot.slane %v2549_v34, 4  ;;  %1721 = vmatpush.msra.mxu1 %v1694_v8  ;;  %v1689_v18 = vld [vmem:[%s2782_s5 + $0xd0] sm:$0xff]  ;;  %v1666_v29 = vld [vmem:[%s2782_s5 + $0x18] sm:$0xff] }
 0x1d6   :  { %1559 = vmatmul.f32.vlgmr.msra.gmra.mxu2 %v2549_v34  ;;  %1577 = vmatpush.msra.mxu3 %v1467_v27  ;;  %v1665_v27 = vld [vmem:[%s2782_s5 + $0x10] sm:$0xff] }
 0x1d7   :  { %1638 = vmatpush.msrb.mxu2 %v1434_v4  ;;  %1702 = vmatpush.msra.mxu0 %v1677_v13  ;;  %v1687_v4 = vld [vmem:[%s2782_s5 + $0xc0] sm:$0xff] }
 0x1d8   :  { %1578 = vmatpush.msra.mxu3 %v1465_v30  ;;  %1722 = vmatpush.msra.mxu1 %v1693_v10  ;;  %v1664_v30 = vld [vmem:[%s2782_s5 + $0x8] sm:$0xff] }
 0x1d9   :  { %1807 = vmatpush.msra.mxu2 %v1678_v7 }
 0x1da   :  { %1643 = vmatpush.msrb.mxu3 %v1496_v31  ;;  %1723 = vmatpush.msra.mxu1 %v1692_v11  ;;  %v1684_v31 = vld [vmem:[%s2782_s5 + $0xa8] sm:$0xff] }
 0x1db   :  { %1808 = vmatpush.msra.mxu2 %v1677_v13 }
 0x1dc   :  { %1644 = vmatpush.msrb.mxu3 %v1494_v17  ;;  %1724 = vmatpush.msra.mxu1 %v1691_v12  ;;  %v1663_v17 = vld [vmem:[%s2782_s5] sm:$0xff] }
 0x1de   :  { %1639 = vmatmul.f32.vlgmr.msrb.gmra.mxu2 %v2549_v34  ;;  %1645 = vmatpush.msrb.mxu3 %v1492_v33  ;;  %v1667_v34 = vld [vmem:[%s2782_s5 + $0x20] sm:$0xff] }
 0x1df   :  { %1725 = vmatpush.msra.mxu1 %v1690_v16  ;;  %v1683_v33 = vld [vmem:[%s2782_s5 + $0xa0] sm:$0xff] }
 0x1e0   :  { %1646 = vmatpush.msrb.mxu3 %v1490_v35  ;;  %v1682_v35 = vld [vmem:[%s2782_s5 + $0x98] sm:$0xff] }
 0x1e1   :  { %1726 = vmatpush.msra.mxu1 %v1689_v18 }
 0x1e2   :  { %1647 = vmatpush.msrb.mxu3 %v1488_v37  ;;  %v1681_v37 = vld [vmem:[%s2782_s5 + $0x90] sm:$0xff] }
 0x1e3   :  { %1727 = vmatpush.msra.mxu1 %v1688_v19 }
 0x1e4   :  { %1648 = vmatpush.msrb.mxu3 %v1486_v23  ;;  %v1680_v23 = vld [vmem:[%s2782_s5 + $0x88] sm:$0xff] }
 0x1e5   :  { %1728 = vmatpush.msra.mxu1 %v1687_v4 }
 0x1e6   :  { %1649 = vmatpush.msrb.mxu3 %v1484_v36  ;;  %v1679_v36 = vld [vmem:[%s2782_s5 + $0x80] sm:$0xff] }
 0x1e7   :  { %1729 = vmatpush.msra.mxu1 %v1686_v24 }
 0x1e8   :  { %1650 = vmatpush.msrb.mxu3 %v1482_v38  ;;  %v1497_v38 = vld [vmem:[#allocation8] sm:$0x3] }
 0x1e9   :  { %1730 = vmatpush.msra.mxu1 %v1685_v25 }
 0x1ea   :  { %1651 = vmatpush.msrb.mxu3 %v1480_v39  ;;  %v1499_v39 = vperm.slane %v1497_v38, 0 }
 0x1eb   :  { %1731 = vmatpush.msra.mxu1 %v1684_v31 }
 0x1ec   :  { %1652 = vmatpush.msrb.mxu3 %v1478_v28 }
 0x1ed   :  { %1732 = vmatpush.msra.mxu1 %v1683_v33 }
 0x1ee   :  { %1653 = vmatpush.msrb.mxu3 %v1476_v40 }
 0x1ef   :  { %1733 = vmatpush.msra.mxu1 %v1682_v35 }
 0x1f0   :  { %1654 = vmatpush.msrb.mxu3 %v1474_v41 }
 0x1f1   :  { %1734 = vmatpush.msra.mxu1 %v1681_v37 }
 0x1f2   :  { %1655 = vmatpush.msrb.mxu3 %v1472_v42 }
 0x1f3   :  { %1735 = vmatpush.msra.mxu1 %v1680_v23 }
 0x1f4   :  { %1656 = vmatpush.msrb.mxu3 %v1470_v43 }
 0x1f5   :  { %1736 = vmatpush.msra.mxu1 %v1679_v36 }
 0x1f6   :  { %1657 = vmatpush.msrb.mxu3 %v1468_v44  ;;  %v1500_v44 = vperm.slane %v1497_v38, 1 }
 0x1f8   :  { %1658 = vmatpush.msrb.mxu3 %v1466_v45 }
 0x201   :  { %v1199_v47 = vpop.f32.mrf.mxu0 }
 0x202   :  { %v1200_v48 = vadd.f32 %v1199_v47, %v676_v46  ;;  %v1219_v49 = vpop.f32.mrf.mxu1 }
 0x204   :  { %v1220_v50 = vadd.f32 %v1219_v49, %v1200_v48 }
 0x205   :  { %v1239_v51 = vpop.f32.mrf.mxu2 }
 0x206   :  { %v1240_v52 = vadd.f32 %v1239_v51, %v1220_v50  ;;  %v1259_v53 = vpop.f32.mrf.mxu3 }
 0x208   :  { %v1260_v54 = vadd.f32 %v1259_v53, %v1240_v52 }
 0x20d   :  { %v1279_v55 = vpop.f32.mrf.mxu0 }
 0x20e   :  { %v1280_v56 = vadd.f32 %v1279_v55, %v1260_v54  ;;  %v1299_v57 = vpop.f32.mrf.mxu1 }
 0x210   :  { %v1300_v58 = vadd.f32 %v1299_v57, %v1280_v56  ;;  %v1697_v56 = vld [vmem:[#allocation10 + $0x10] sm:$0xff]  ;;  %v1698_v57 = vld [vmem:[#allocation10 + $0x18] sm:$0xff] }
 0x211   :  { %1795 = vmatpush.msrb.mxu1 %v1698_v57 }
 0x215   :  { %v1319_v59 = vpop.f32.mrf.mxu2 }
 0x216   :  { %v1320_v60 = vadd.f32 %v1319_v59, %v1300_v58  ;;  %v1695_v58 = vld [vmem:[#allocation10] sm:$0xff]  ;;  %v1696_v59 = vld [vmem:[#allocation10 + $0x8] sm:$0xff] }
 0x217   :  { %1796 = vmatpush.msrb.mxu1 %v1696_v59 }
 0x219   :  { %v1339_v62 = vpop.f32.mrf.mxu3 }
 0x21a   :  { %v1340_v63 = vadd.f32 %v1339_v62, %v1320_v60  ;;  %v2355_v60 = vmov 2.0  }
 0x21b   :  { %2103 = vrcp.f32 %v2355_v60  ;;  %v1980_v60 = vld [vmem:[%s2786_s9 + $0x38] sm:$0xff] }
 0x21c   :  { %vm1345_vm4 = vcmp.ge.f32.partialorder %v1340_v63, 0.0  ;;  %v1349_v32 = vmul.f32 0.2, %v1340_v63 }
 0x21e   :  { %v1353_v0 = vsel %vm1345_vm4, %v1340_v63, %v1349_v32 }
 0x21f   :  { %v1360_v1 = vrot.slane %v1353_v0, 2  ;;  %1579 = vmatmul.f32.vlgmr.msra.gmra.mxu3 %v1353_v0 }
 0x220   :  { %1827 = vmatpush.msra.mxu3 %v1694_v8 }
 0x221   :  { %v1364_v5 = vsel %vm1363_vm5, %v1359_v9, %v1360_v1  ;;  %v2104_v62 = vpop.eup %2103 }
 0x222   :  { %v1366_v6 = vsel %vm1365_vm6, %v2542_v22, %v1364_v5  ;;  %v1676_v22 = vld [vmem:[%s2782_s5 + $0x68] sm:$0xff]  ;;  %1828 = vmatpush.msra.mxu3 %v1693_v10  ;;  %v1750_v63 = vmul.f32 2.0, %v2104_v62  ;;  %vm1754_vm8 = vweird.f32 %v2104_v62 }
 0x223   :  { %1368 = vst [vmem:[%s2788_s11] sm:$0xff] %v1366_v6  ;;  %1703 = vmatpush.msra.mxu0 %v1676_v22  ;;  %1809 = vmatpush.msra.mxu2 %v1676_v22 }
 0x224   :  { %1829 = vmatpush.msra.mxu3 %v1692_v11  ;;  %v1751_v1 = vsub.f32 1.0, %v1750_v63  ;;  %v1979_v63 = vld [vmem:[%s2786_s9 + $0x30] sm:$0xff] }
 0x225   :  { %1704 = vmatpush.msra.mxu0 %v1675_v15  ;;  %1810 = vmatpush.msra.mxu2 %v1675_v15 }
 0x226   :  { %1830 = vmatpush.msra.mxu3 %v1691_v12  ;;  %v1752_v7 = vmul.f32 %v2104_v62, %v1751_v1  ;;  %v1977_v1 = vld [vmem:[%s2786_s9 + $0x20] sm:$0xff] }
 0x227   :  { %1659 = vmatmul.f32.vlgmr.msrb.gmra.mxu3 %v1353_v0  ;;  %1705 = vmatpush.msra.mxu0 %v1674_v14 }
 0x228   :  { %1811 = vmatpush.msra.mxu2 %v1674_v14  ;;  %1831 = vmatpush.msra.mxu3 %v1690_v16  ;;  %v1753_v22 = vadd.f32 %v2104_v62, %v1752_v7  ;;  %v1992_v7 = vld [vmem:[%s2786_s9 + $0x98] sm:$0xff] }
 0x229   :  { %1706 = vmatpush.msra.mxu0 %v1673_v61 }
 0x22a   :  { %1812 = vmatpush.msra.mxu2 %v1673_v61  ;;  %1832 = vmatpush.msra.mxu3 %v1689_v18  ;;  %v1755_v15 = vsel %vm1754_vm8, %v2104_v62, %v1753_v22  ;;  %v1996_v62 = vld [vmem:[%s2786_s9 + $0xb8] sm:$0xff]  ;;  %v1974_v22 = vld [vmem:[%s2786_s9 + $0x8] sm:$0xff] }
 0x22b   :  { %1707 = vmatpush.msra.mxu0 %v1672_v20 }
 0x22c   :  { %1813 = vmatpush.msra.mxu2 %v1672_v20  ;;  %1833 = vmatpush.msra.mxu3 %v1688_v19 }
 0x22d   :  { %1708 = vmatpush.msra.mxu0 %v1671_v2 }
 0x22e   :  { %1814 = vmatpush.msra.mxu2 %v1671_v2  ;;  %1834 = vmatpush.msra.mxu3 %v1687_v4 }
 0x22f   :  { %1709 = vmatpush.msra.mxu0 %v1670_v21  ;;  %v1520_v28 = vpop.f32.mrf.mxu0 }
 0x230   :  { %1815 = vmatpush.msra.mxu2 %v1670_v21  ;;  %1835 = vmatpush.msra.mxu3 %v1686_v24  ;;  %v1521_v40 = vadd.f32 %v1520_v28, %v1499_v39  ;;  %v1540_v42 = vpop.f32.mrf.mxu1  ;;  %v1986_v39 = vld [vmem:[%s2786_s9 + $0x68] sm:$0xff] }
 0x231   :  { %1710 = vmatpush.msra.mxu0 %v1669_v3  ;;  %v2002_v28 = vld [vmem:[%s2786_s9 + $0xe8] sm:$0xff] }
 0x232   :  { %1816 = vmatpush.msra.mxu2 %v1669_v3  ;;  %1836 = vmatpush.msra.mxu3 %v1685_v25  ;;  %v1541_v43 = vadd.f32 %v1540_v42, %v1521_v40  ;;  %v1985_v40 = vld [vmem:[%s2786_s9 + $0x60] sm:$0xff]  ;;  %v1984_v42 = vld [vmem:[%s2786_s9 + $0x58] sm:$0xff] }
 0x233   :  { %1711 = vmatpush.msra.mxu0 %v1668_v26 }
 0x234   :  { %1817 = vmatpush.msra.mxu2 %v1668_v26  ;;  %1837 = vmatpush.msra.mxu3 %v1684_v31 }
 0x235   :  { %1712 = vmatpush.msra.mxu0 %v1667_v34 }
 0x236   :  { %1818 = vmatpush.msra.mxu2 %v1667_v34  ;;  %1838 = vmatpush.msra.mxu3 %v1683_v33 }
 0x237   :  { %1713 = vmatpush.msra.mxu0 %v1666_v29 }
 0x238   :  { %1819 = vmatpush.msra.mxu2 %v1666_v29  ;;  %1839 = vmatpush.msra.mxu3 %v1682_v35  ;;  %v1988_v35 = vld [vmem:[%s2786_s9 + $0x78] sm:$0xff] }
 0x239   :  { %1714 = vmatpush.msra.mxu0 %v1665_v27 }
 0x23a   :  { %1820 = vmatpush.msra.mxu2 %v1665_v27  ;;  %1840 = vmatpush.msra.mxu3 %v1681_v37  ;;  %v2004_v37 = vld [vmem:[%s2786_s9 + $0xf8] sm:$0xff] }
 0x23b   :  { %1715 = vmatpush.msra.mxu0 %v1664_v30 }
 0x23c   :  { %1821 = vmatpush.msra.mxu2 %v1664_v30  ;;  %1841 = vmatpush.msra.mxu3 %v1680_v23  ;;  %v1987_v23 = vld [vmem:[%s2786_s9 + $0x70] sm:$0xff] }
 0x23d   :  { %1716 = vmatpush.msra.mxu0 %v1663_v17 }
 0x23e   :  { %1822 = vmatpush.msra.mxu2 %v1663_v17  ;;  %1842 = vmatpush.msra.mxu3 %v1679_v36  ;;  %v2003_v36 = vld [vmem:[%s2786_s9 + $0xf0] sm:$0xff] }
 0x23f   :  { %1775 = vmatpush.msrb.mxu0 %v1697_v56 }
 0x240   :  { %2009 = vmatpush.msrb.mxu2 %v1988_v35  ;;  %2029 = vmatpush.msrb.mxu3 %v2004_v37 }
 0x241   :  { %1776 = vmatpush.msrb.mxu0 %v1695_v58 }
 0x242   :  { %2010 = vmatpush.msrb.mxu2 %v1987_v23  ;;  %2030 = vmatpush.msrb.mxu3 %v2003_v36 }
 0x244   :  { %2011 = vmatpush.msrb.mxu2 %v1986_v39  ;;  %2031 = vmatpush.msrb.mxu3 %v2002_v28 }
 0x246   :  { %2012 = vmatpush.msrb.mxu2 %v1985_v40 }
 0x248   :  { %2013 = vmatpush.msrb.mxu2 %v1984_v42 }
 0x24f   :  { %v1600_v45 = vpop.f32.mrf.mxu0 }
 0x250   :  { %v1601_v48 = vadd.f32 %v1600_v45, %v1500_v44  ;;  %v1620_v50 = vpop.f32.mrf.mxu1  ;;  %v1983_v44 = vld [vmem:[%s2786_s9 + $0x50] sm:$0xff] }
 0x251   :  { %v1999_v45 = vld [vmem:[%s2786_s9 + $0xd0] sm:$0xff]  ;;  %2014 = vmatpush.msrb.mxu2 %v1983_v44 }
 0x252   :  { %v1621_v52 = vadd.f32 %v1620_v50, %v1601_v48  ;;  %v1998_v48 = vld [vmem:[%s2786_s9 + $0xc8] sm:$0xff]  ;;  %v1981_v50 = vld [vmem:[%s2786_s9 + $0x40] sm:$0xff] }
 0x259   :  { %v1560_v41 = vpop.f32.mrf.mxu2 }
 0x25a   :  { %v1561_v46 = vadd.f32 %v1560_v41, %v1541_v43  ;;  %v2001_v41 = vld [vmem:[%s2786_s9 + $0xe0] sm:$0xff]  ;;  %v2000_v43 = vld [vmem:[%s2786_s9 + $0xd8] sm:$0xff] }
 0x25b   :  { %2032 = vmatpush.msrb.mxu3 %v2001_v41 }
 0x25d   :  { %2033 = vmatpush.msrb.mxu3 %v2000_v43 }
 0x25f   :  { %2034 = vmatpush.msrb.mxu3 %v1999_v45 }
 0x261   :  { %v1640_v51 = vpop.f32.mrf.mxu2  ;;  %2035 = vmatpush.msrb.mxu3 %v1998_v48 }
 0x262   :  { %v1641_v53 = vadd.f32 %v1640_v51, %v1621_v52  ;;  %v1997_v51 = vld [vmem:[%s2786_s9 + $0xc0] sm:$0xff] }
 0x263   :  { %2036 = vmatpush.msrb.mxu3 %v1997_v51 }
 0x265   :  { %2037 = vmatpush.msrb.mxu3 %v1996_v62 }
 0x2a2   :  { %v1580_v47 = vpop.f32.mrf.mxu3 }
 0x2a3   :  { %v1581_v49 = vadd.f32 %v1580_v47, %v1561_v46  ;;  %v1982_v47 = vld [vmem:[%s2786_s9 + $0x48] sm:$0xff] }
 0x2a4   :  { %2015 = vmatpush.msrb.mxu2 %v1982_v47 }
 0x2a5   :  { %1717 = vmatmul.f32.vlgmr.msra.gmra.mxu0 %v1581_v49 }
 0x2a6   :  { %1884 = vmatpush.msra.mxu0 %v1697_v56  ;;  %2016 = vmatpush.msrb.mxu2 %v1981_v50 }
 0x2a8   :  { %1885 = vmatpush.msra.mxu0 %v1695_v58  ;;  %2017 = vmatpush.msrb.mxu2 %v1980_v60 }
 0x2aa   :  { %v1660_v54 = vpop.f32.mrf.mxu3  ;;  %2018 = vmatpush.msrb.mxu2 %v1979_v63 }
 0x2ab   :  { %v1661_v55 = vadd.f32 %v1660_v54, %v1641_v53 }
 0x2ad   :  { %1737 = vmatmul.f32.vlgmr.msra.gmra.mxu1 %v1661_v55 }
 0x2ae   :  { %1904 = vmatpush.msra.mxu1 %v1698_v57 }
 0x2b0   :  { %1905 = vmatpush.msra.mxu1 %v1696_v59 }
 0x322   :  { %v1718_v32 = vpop.f32.mrf.mxu0 }
 0x32a   :  { %v1738_v0 = vpop.f32.mrf.mxu1 }
 0x32b   :  { %v1739_v9 = vadd.f32 %v1738_v0, %v1718_v32  ;;  %v1995_v32 = vld [vmem:[%s2786_s9 + $0xb0] sm:$0xff]  ;;  %v1978_v0 = vld [vmem:[%s2786_s9 + $0x28] sm:$0xff] }
 0x32c   :  { %2038 = vmatpush.msrb.mxu3 %v1995_v32  ;;  %2019 = vmatpush.msrb.mxu2 %v1978_v0 }
 0x32d   :  { %v1742_v5 = vsel %vm1741_vm7, %v1739_v9, 0.0  ;;  %v1994_v9 = vld [vmem:[%s2786_s9 + $0xa8] sm:$0xff] }
 0x32e   :  { %v1743_v6 = vrot.slane %v1742_v5, 4  ;;  %2039 = vmatpush.msrb.mxu3 %v1994_v9  ;;  %2020 = vmatpush.msrb.mxu2 %v1977_v1 }
 0x330   :  { %v1744_v13 = vadd.f32 %v1743_v6, %v1742_v5  ;;  %v1993_v5 = vld [vmem:[%s2786_s9 + $0xa0] sm:$0xff]  ;;  %v1976_v6 = vld [vmem:[%s2786_s9 + $0x18] sm:$0xff] }
 0x331   :  { %2040 = vmatpush.msrb.mxu3 %v1993_v5  ;;  %2021 = vmatpush.msrb.mxu2 %v1976_v6 }
 0x332   :  { %v1745_v8 = vrot.slane %v1744_v13, 2 }
 0x333   :  { %2041 = vmatpush.msrb.mxu3 %v1992_v7 }
 0x334   :  { %v1746_v10 = vadd.f32 %v1745_v8, %v1744_v13  ;;  %v1975_v13 = vld [vmem:[%s2786_s9 + $0x10] sm:$0xff] }
 0x335   :  { %v1991_v8 = vld [vmem:[%s2786_s9 + $0x90] sm:$0xff]  ;;  %2022 = vmatpush.msrb.mxu2 %v1975_v13 }
 0x336   :  { %v1747_v11 = vrot.slane %v1746_v10, 1  ;;  %2042 = vmatpush.msrb.mxu3 %v1991_v8 }
 0x337   :  { %2023 = vmatpush.msrb.mxu2 %v1974_v22 }
 0x338   :  { %v1748_v12 = vadd.f32 %v1747_v11, %v1746_v10  ;;  %v1990_v10 = vld [vmem:[%s2786_s9 + $0x88] sm:$0xff]  ;;  %v1973_v11 = vld [vmem:[%s2786_s9] sm:$0xff] }
 0x339   :  { %2043 = vmatpush.msrb.mxu3 %v1990_v10  ;;  %2024 = vmatpush.msrb.mxu2 %v1973_v11 }
 0x33a   :  { %v1756_v14 = vmul.f32 %v1755_v15, %v1748_v12 }
 0x33c   :  { %2082 = vmatmul.msk.f32.vlgmr.msrb.gmra.mxu0 %vm1757_vm9, %v1756_v14  ;;  %2083 = vmatmul.msk.f32.vlgmr.msrb.gmra.mxu1 %vm1757_vm9, %v1756_v14 }
 0x33d   :  { %1931 = vmatpush.msrb.mxu0 %v1697_v56  ;;  %1951 = vmatpush.msrb.mxu1 %v1698_v57 }
 0x33f   :  { %1932 = vmatpush.msrb.mxu0 %v1695_v58  ;;  %1952 = vmatpush.msrb.mxu1 %v1696_v59  ;;  %v1700_v59 = vld [vmem:[#allocation13] sm:$0x1] }
 0x3b9   :  { %v1778_v16 = vpop.f32.mrf.mxu0  ;;  %v1798_v61 = vpop.f32.mrf.mxu1 }
 0x3ba   :  { %v1801_v18 = vperm.slane %v1778_v16, 0  ;;  %v1802_v20 = vperm.slane %v1798_v61, 0 }
 0x3bc   :  { %v2658_v19 = vsub.f32 %v1581_v49, %v1801_v18  ;;  %v2660_v2 = vsub.f32 %v1661_v55, %v1802_v20  ;;  %v1699_v55 = vld [vmem:[#allocation11] sm:$0x1] }
 0x3be   :  { %v1805_v4 = vmul.f32 %v2658_v19, %v2658_v19  ;;  %v1806_v21 = vmul.f32 %v2660_v2, %v2660_v2 }
 0x3c0   :  { %1823 = vmatmul.f32.vlgmr.msra.gmra.mxu2 %v1805_v4  ;;  %1843 = vmatmul.f32.vlgmr.msra.gmra.mxu3 %v1806_v21 }
 0x443   :  { %v1824_v24 = vpop.f32.mrf.mxu2  ;;  %v1844_v3 = vpop.f32.mrf.mxu3 }
 0x444   :  { %v1845_v25 = vadd.f32 %v1844_v3, %v1824_v24 }
 0x446   :  { %v1847_v26 = vsel %vm1741_vm7, %v1845_v25, 0.0 }
 0x447   :  { %v1848_v34 = vrot.slane %v1847_v26, 4 }
 0x449   :  { %v1849_v29 = vadd.f32 %v1848_v34, %v1847_v26 }
 0x44b   :  { %v1850_v27 = vrot.slane %v1849_v29, 2 }
 0x44d   :  { %v1851_v30 = vadd.f32 %v1850_v27, %v1849_v29 }
 0x44f   :  { %v1852_v31 = vrot.slane %v1851_v30, 1 }
 0x451   :  { %v1853_v17 = vadd.f32 %v1852_v31, %v1851_v30 }
 0x453   :  { %v1854_v33 = vmul.f32 %v1853_v17, %v1755_v15  ;;  %v1989_v15 = vld [vmem:[%s2786_s9 + $0x80] sm:$0xff] }
 0x454   :  { %2044 = vmatpush.msrb.mxu3 %v1989_v15 }
 0x455   :  { %v1855_v38 = vadd.f32 1e-05, %v1854_v33 }
 0x457   :  { %2105 = vrsqrt.f32 %v1855_v38  ;;  %vm1862_vm11 = vweird.f32 %v1855_v38 }
 0x45d   :  { %v2106_v46 = vpop.eup %2105 }
 0x45e   :  { %v1857_v49 = vmul.f32 %v2106_v46, %v1855_v38  ;;  %vm1863_vm10 = vweird.f32 %v2106_v46 }
 0x45f   :  { %vm1864_vm12 = vmor %vm1862_vm11, %vm1863_vm10 }
 0x460   :  { %v1858_v52 = vmul.f32 %v2106_v46, %v1857_v49 }
 0x462   :  { %v1859_v53 = vmul.f32 0.5, %v1858_v52 }
 0x464   :  { %v1860_v54 = vsub.f32 1.5, %v1859_v53 }
 0x466   :  { %v1861_v56 = vmul.f32 %v2106_v46, %v1860_v54 }
 0x468   :  { %v1865_v57 = vsel %vm1864_vm12, %v2106_v46, %v1861_v56 }
 0x469   :  { %v1866_v58 = vmul.f32 %v1865_v57, %v1699_v55 }
 0x46b   :  { %2084 = vmatmul.msk.f32.vlgmr.msra.gmra.mxu0 %vm1757_vm9, %v1866_v58  ;;  %2085 = vmatmul.msk.f32.vlgmr.msra.gmra.mxu1 %vm1757_vm9, %v1866_v58 }
 0x473   :  { %2086 = vmatmul.msk.f32.vlgmr.msrb.gmra.mxu0 %vm1757_vm9, %v1700_v59  ;;  %2087 = vmatmul.msk.f32.vlgmr.msrb.gmra.mxu1 %vm1757_vm9, %v1700_v59 }
 0x4e8   :  { %v1887_v12 = vpop.f32.mrf.mxu0  ;;  %v1907_v14 = vpop.f32.mrf.mxu1 }
 0x4e9   :  { %v1910_v16 = vperm.slane %v1887_v12, 0  ;;  %v1911_v61 = vperm.slane %v1907_v14, 0 }
 0x4eb   :  { %v1912_v4 = vmul.f32 %v1910_v16, %v2658_v19  ;;  %v1913_v21 = vmul.f32 %v1911_v61, %v2660_v2  ;;  %v2102_v19 = vld [vmem:[#allocation14] ss:$0 sm:$0xff] }
 0x4f0   :  { %v1934_v18 = vpop.f32.mrf.mxu0  ;;  %v1954_v20 = vpop.f32.mrf.mxu1 }
 0x4f1   :  { %v1957_v24 = vperm.slane %v1934_v18, 0  ;;  %v1958_v3 = vperm.slane %v1954_v20, 0 }
 0x4f3   :  { %v1959_v25 = vadd.f32 %v1957_v24, %v1912_v4  ;;  %v1960_v26 = vadd.f32 %v1958_v3, %v1913_v21 }
 0x4f5   :  { %v1963_v34 = vmul.f32 0.2, %v1959_v25  ;;  %v1964_v29 = vmul.f32 0.2, %v1960_v26  ;;  %vm1961_vm13 = vcmp.ge.f32.partialorder %v1959_v25, 0.0  ;;  %vm1962_vm14 = vcmp.ge.f32.partialorder %v1960_v26, 0.0 }
 0x4f7   :  { %v1965_v27 = vsel %vm1961_vm13, %v1959_v25, %v1963_v34  ;;  %v1966_v30 = vsel %vm1962_vm14, %v1960_v26, %v1964_v29 }
 0x4f8   :  { %2025 = vmatmul.f32.vlgmr.msrb.gmra.mxu2 %v1965_v27  ;;  %v1969_v31 = vrot.slane %v1966_v30, 6  ;;  %2045 = vmatmul.f32.vlgmr.msrb.gmra.mxu3 %v1966_v30 }
 0x4fa   :  { %v1970_v17 = vsel %vm1361_vm2, %v1965_v27, %v1969_v31 }
 0x4fb   :  { %1972 = vst [vmem:[%s2789_s12] sm:$0xf] %v1970_v17 }
 0x57b   :  { %v2026_v2 = vpop.f32.mrf.mxu2  ;;  %v2046_v35 = vpop.f32.mrf.mxu3 }
 0x57c   :  { %v2027_v33 = vadd.f32 %v2102_v19, %v2026_v2 }
 0x57e   :  { %v2047_v37 = vadd.f32 %v2046_v35, %v2027_v33 }
 0x580   :  { %vm2049_vm15 = vcmp.ge.f32.partialorder %v2047_v37, 0.0  ;;  %v2050_v23 = vmul.f32 0.2, %v2047_v37 }
 0x582   :  { %v2051_v36 = vsel %vm2049_vm15, %v2047_v37, %v2050_v23 }
 0x583   :  { %2052 = vst.msk [vmem:[#allocation16] sm:$0x3] %vm1741_vm7, %v2051_v36 }
 0x584   :  { %2067 = dma.vmem_to_hbm [thread:$0]  %s2063_s6, 32, %s2065_s10, [#allocation4]  }
 0x585   :  { %2341 = dma.done.wait [#allocation4], 32  }
 0x586   :  { %2342 = vsyncadd [#allocation4], 4294967264 }
 0x587   :  { %2076 = vsyncpa [#allocation3], 1 }
 0x588   :  { %2077 = vsyncpa [#allocation6], 1 }
 0x589   :  { %2078 = vsyncpa [#allocation9], 1 }
 0x58a   :  { %2079 = vsyncpa [#allocation12], 1 }
 0x58b   :  { %2080 = vsyncpa [#allocation15], 1 }
 0x58c   :  { %2081 = vsyncpa [#allocation4], 1 }

</bundles_post_ra>
